<compile_context>
chip_gen: v6e
topology: v6e:2x2x1
jax: 0.10.0
libtpu: 0.0.40
codegen_flags: <defaults>
</compile_context>

<pallas_src>
import functools

import jax
import jax.numpy as jnp
from jax.experimental import pallas as pl
from jax.experimental.pallas import tpu as pltpu

EPS = 1e-5
LANES = 128     # pad Cout to a multiple of this (lane-dense stores / MXU cols)
K_ALIGN = 16    # bf16 sublane packing for the contraction dim
TILE_N = 256    # rows (of B*H*W) per grid step; raise to 512-2048 at large
                # shapes, keeping 2x-buffered tiles well under v7x's 64 MiB VMEM


# ---------------------------------------------------------------------------
# Pallas kernels
# ---------------------------------------------------------------------------
def _stats_slab(acc):
    """Pack per-channel sum (row 0) and sum-of-squares (row 1) into (8, CPAD)."""
    cpad = acc.shape[1]
    csum = jnp.sum(acc, axis=0, keepdims=True)           # (1, CPAD)
    cssq = jnp.sum(acc * acc, axis=0, keepdims=True)     # (1, CPAD)
    row = jax.lax.broadcasted_iota(jnp.int32, (8, cpad), 0)
    return jnp.where(row == 0, csum, jnp.where(row == 1, cssq, 0.0))


def conv1_stats_kernel(p_ref, w_ref, acc_ref, stats_ref):
    # p_ref: (TILE_N, K) bf16 im2col patches; w_ref: (K, CPAD) bf16 weights.
    acc = jnp.dot(p_ref[...], w_ref[...], preferred_element_type=jnp.float32)
    acc_ref[...] = acc
    stats_ref[...] = _stats_slab(acc)[None]


def conv2_stats_kernel(pa_ref, pb_ref, wa_ref, wb_ref, acc_ref, stats_ref):
    # Dense-concat conv as split-K: two MXU dots (x-patches, y1-patches) summed.
    acc = jnp.dot(pa_ref[...], wa_ref[...], preferred_element_type=jnp.float32)
    acc = acc + jnp.dot(pb_ref[...], wb_ref[...], preferred_element_type=jnp.float32)
    acc_ref[...] = acc
    stats_ref[...] = _stats_slab(acc)[None]


def bn_relu_kernel(a_ref, scale_ref, shift_ref, o_ref):
    # Lean epilogue: y = max(a * scale + shift, 0) with per-channel scale/shift.
    y = a_ref[...] * scale_ref[...] + shift_ref[...]
    o_ref[...] = jnp.maximum(y, 0.0).astype(o_ref.dtype)


# ---------------------------------------------------------------------------
# pallas_call wrappers
# ---------------------------------------------------------------------------
def conv_stats(patches, weights, tile_n=TILE_N):
    """patches/weights: equal-length lists (1 pair for conv1, 2 for conv2).
    Returns (acc (Npad, CPAD) f32, per-tile stats (nt, 8, CPAD) f32)."""
    n_pad = patches[0].shape[0]
    cpad = weights[0].shape[1]
    nt = n_pad // tile_n
    kernel = conv1_stats_kernel if len(patches) == 1 else conv2_stats_kernel
    in_specs = (
        [pl.BlockSpec((tile_n, p.shape[1]), lambda i: (i, 0)) for p in patches]
        + [pl.BlockSpec((w.shape[0], cpad), lambda i: (0, 0)) for w in weights]
    )
    acc, partial_stats = pl.pallas_call(
        kernel,
        grid=(nt,),
        in_specs=in_specs,
        out_specs=(
            pl.BlockSpec((tile_n, cpad), lambda i: (i, 0)),
            pl.BlockSpec((1, 8, cpad), lambda i: (i, 0, 0)),
        ),
        out_shape=(
            jax.ShapeDtypeStruct((n_pad, cpad), jnp.float32),
            jax.ShapeDtypeStruct((nt, 8, cpad), jnp.float32),
        ),
        compiler_params=pltpu.CompilerParams(dimension_semantics=("parallel",)),
    )(*patches, *weights)
    return acc, partial_stats


def bn_relu_apply(acc, scale, shift, out_dtype, tile_n=TILE_N):
    n_pad, cpad = acc.shape
    nt = n_pad // tile_n
    return pl.pallas_call(
        bn_relu_kernel,
        grid=(nt,),
        in_specs=[
            pl.BlockSpec((tile_n, cpad), lambda i: (i, 0)),
            pl.BlockSpec((1, cpad), lambda i: (0, 0)),
            pl.BlockSpec((1, cpad), lambda i: (0, 0)),
        ],
        out_specs=pl.BlockSpec((tile_n, cpad), lambda i: (i, 0)),
        out_shape=jax.ShapeDtypeStruct((n_pad, cpad), out_dtype),
        compiler_params=pltpu.CompilerParams(dimension_semantics=("parallel",)),
    )(acc, scale, shift)


# ---------------------------------------------------------------------------
# Glue (layout plumbing only, no heavy compute)
# ---------------------------------------------------------------------------
def _round_up(x, m):
    return (x + m - 1) // m * m


def _pad_to(a, axis, size):
    pad = size - a.shape[axis]
    if pad <= 0:
        return a
    widths = [(0, 0)] * a.ndim
    widths[axis] = (0, pad)
    return jnp.pad(a, widths)


def im2col(x_nhwc, ksize):
    """(B,H,W,C) -> (B*H*W, ksize*ksize*C), 'same' zero padding, stride 1."""
    B, H, W, C = x_nhwc.shape
    p = ksize // 2
    xp = jnp.pad(x_nhwc, ((0, 0), (p, p), (p, p), (0, 0)))
    cols = [xp[:, kh:kh + H, kw:kw + W, :]
            for kh in range(ksize) for kw in range(ksize)]
    patches = jnp.concatenate(cols, axis=-1)             # (B, H, W, k*k*C)
    return patches.reshape(B * H * W, ksize * ksize * C)


def _batch_scale_shift(partial_stats, gamma_pad, beta_pad, n_rows):
    """Reduce per-tile partials -> per-channel (scale, shift): y = x*scale+shift."""
    stats = jnp.sum(partial_stats, axis=0)                # (8, CPAD)
    mean = stats[0] / n_rows
    var = jnp.maximum(stats[1] / n_rows - mean * mean, 0.0)
    scale = gamma_pad * jax.lax.rsqrt(var + EPS)
    shift = beta_pad - mean * scale
    return scale[None, :], shift[None, :]


def init_conv_block_params(key, in_channels, out_channels, ksize=3):
    """Kaiming-normal conv weights (fan_in, gain=sqrt(2)), BN gamma=1 / beta=0 —
    matching ConvBlock._init_weights. Conv biases are init-zero in the reference
    and are cancelled exactly by training-mode BN -> omitted."""
    k1, k2 = jax.random.split(key)

    def kaiming(k, fan_cin, shape):
        std = (2.0 / (fan_cin * ksize * ksize)) ** 0.5
        return jax.random.normal(k, shape, jnp.float32) * std

    cin2 = in_channels + out_channels
    w2_full = kaiming(k2, cin2, (ksize, ksize, cin2, out_channels))
    return {
        # stored as (KH*KW*Cin, Cout) matching the im2col feature order
        "w1": kaiming(k1, in_channels,
                      (ksize, ksize, in_channels, out_channels)).reshape(-1, out_channels),
        # conv2 weight split along input channels: [x-part | y1-part]
        "w2x": w2_full[:, :, :in_channels, :].reshape(-1, out_channels),
        "w2y": w2_full[:, :, in_channels:, :].reshape(-1, out_channels),
        "g1": jnp.ones((out_channels,), jnp.float32),
        "beta1": jnp.zeros((out_channels,), jnp.float32),
        "g2": jnp.ones((out_channels,), jnp.float32),
        "beta2": jnp.zeros((out_channels,), jnp.float32),
    }


@functools.partial(jax.jit, static_argnames=("ksize", "pool"))
def conv_block_forward(x_nchw, params, ksize=3, pool=True):
    """Forward pass equivalent to ConvBlock.forward on NCHW input."""
    B, Cin, H, W = x_nchw.shape
    Cout = params["w1"].shape[1]
    cpad = _round_up(max(Cout, LANES), LANES)     # lane-dense output channels
    N = B * H * W
    n_pad = _round_up(N, TILE_N)

    def prep_patches(nhwc):
        p = im2col(nhwc.astype(jnp.bfloat16), ksize)           # bf16 halves DMA bytes
        p = _pad_to(p, 1, _round_up(p.shape[1], K_ALIGN))      # sublane-align K
        return _pad_to(p, 0, n_pad)                            # zero rows: stats unaffected

    def prep_weight(w):
        w = _pad_to(w, 1, cpad)                                # zero extra out-channels
        w = _pad_to(w, 0, _round_up(w.shape[0], K_ALIGN))
        return w.astype(jnp.bfloat16)

    x = jnp.transpose(x_nchw, (0, 2, 3, 1))                    # NCHW -> NHWC

    # ---- conv1 + BN + ReLU (two-pass BN) ----------------------------------
    p_x = prep_patches(x)
    acc1, st1 = conv_stats([p_x], [prep_weight(params["w1"])])
    sc1, sh1 = _batch_scale_shift(st1, _pad_to(params["g1"], 0, cpad),
                                  _pad_to(params["beta1"], 0, cpad), float(N))
    y1 = bn_relu_apply(acc1, sc1, sh1, jnp.bfloat16)           # only feeds conv2's MXU
    y1_nhwc = y1[:N, :Cout].reshape(B, H, W, Cout)

    # ---- conv2 on concat([x, y1]) without materializing the concat --------
    p_y1 = prep_patches(y1_nhwc)
    acc2, st2 = conv_stats([p_x, p_y1],
                           [prep_weight(params["w2x"]), prep_weight(params["w2y"])])
    sc2, sh2 = _batch_scale_shift(st2, _pad_to(params["g2"], 0, cpad),
                                  _pad_to(params["beta2"], 0, cpad), float(N))
    y2 = bn_relu_apply(acc2, sc2, sh2, jnp.float32)
    y2_nhwc = y2[:N, :Cout].reshape(B, H, W, Cout)

    # ---- 2x2 average pool: VPU reshape-mean (pool-matmul path removed) ----
    if pool:
        out = y2_nhwc.reshape(B, H // 2, 2, W // 2, 2, Cout).mean(axis=(2, 4))
    else:
        out = y2_nhwc
    return jnp.transpose(out, (0, 3, 1, 2))                    # NHWC -> NCHW


# ---------------------------------------------------------------------------
# Pure-JAX reference (same bf16-operand / f32-accumulate strategy) for checking
# ---------------------------------------------------------------------------
def _reference_forward(x_nchw, params, ksize=3, pool=True):
    B, Cin, H, W = x_nchw.shape
    Cout = params["w1"].shape[1]
    x = jnp.transpose(x_nchw, (0, 2, 3, 1))
    dn = ("NHWC", "HWIO", "NHWC")

    def conv_bn_relu(inp, w_hwio, gamma, beta):
        acc = jax.lax.conv_general_dilated(
            inp.astype(jnp.bfloat16), w_hwio.astype(jnp.bfloat16),
            window_strides=(1, 1), padding="SAME", dimension_numbers=dn,
            preferred_element_type=jnp.float32)
        mean = jnp.mean(acc, axis=(0, 1, 2))
        var = jnp.mean(jnp.square(acc - mean), axis=(0, 1, 2))
        y = (acc - mean) * jax.lax.rsqrt(var + EPS) * gamma + beta
        return jnp.maximum(y, 0.0)

    w1 = params["w1"].reshape(ksize, ksize, Cin, Cout)
    w2 = jnp.concatenate([params["w2x"].reshape(ksize, ksize, Cin, Cout),
                          params["w2y"].reshape(ksize, ksize, Cout, Cout)], axis=2)
    y1 = conv_bn_relu(x, w1, params["g1"], params["beta1"]).astype(jnp.bfloat16)
    cat = jnp.concatenate([x, y1.astype(jnp.float32)], axis=-1)
    y2 = conv_bn_relu(cat, w2, params["g2"], params["beta2"])
    if pool:
        out = y2.reshape(B, H // 2, 2, W // 2, 2, Cout).mean(axis=(2, 4))
    else:
        out = y2
    return jnp.transpose(out, (0, 3, 1, 2))


if __name__ == "__main__":
    key = jax.random.PRNGKey(0)
    kx, kp = jax.random.split(key)

    B, Cin, H, W = 2, 4, 16, 16
    Cout = 8
    x = jax.random.normal(kx, (B, Cin, H, W), jnp.float32)     # PyTorch-style NCHW

    params = init_conv_block_params(kp, Cin, Cout, ksize=3)

    out = conv_block_forward(x, params, ksize=3, pool=True)
    out = jax.block_until_ready(out)

    assert out.shape == (B, Cout, H // 2, W // 2), out.shape
    assert bool(jnp.all(jnp.isfinite(out)))

    ref = _reference_forward(x, params, ksize=3, pool=True)
    err = float(jnp.max(jnp.abs(out - ref)))
    assert err < 5e-2, f"mismatch vs reference: max abs err = {err}"

    print("KERNEL_OK")
</pallas_src>

<mosaic_0001>
module attributes {stable_mosaic.version = 11 : i64} {
  func.func @conv1_stats_kernel(%arg0: i32, %arg1: memref<256x48xbf16, #tpu.memory_space<vmem>>, %arg2: memref<48x128xbf16, #tpu.memory_space<vmem>>, %arg3: memref<256x128xf32, #tpu.memory_space<vmem>>, %arg4: memref<1x8x128xf32, #tpu.memory_space<vmem>>) attributes {dimension_semantics = [#tpu.dimension_semantics<parallel>], iteration_bounds = array<i64: 2>, scalar_prefetch = 0 : i64, scratch_operands = 0 : i64, tpu.core_type = #tpu.core_type<tc>, window_params = [{transform_indices = @transform_0, window_bounds = array<i64: 256, 48>}, {pipeline_mode = #tpu.pipeline_mode<synchronous>, transform_indices = @transform_1, window_bounds = array<i64: 48, 128>}, {transform_indices = @transform_2, window_bounds = array<i64: 256, 128>}, {transform_indices = @transform_3, window_bounds = array<i64: 1, 8, 128>}]} {
    %c0 = arith.constant 0 : index
    %c0_0 = arith.constant 0 : index
    %0 = vector.load %arg1[%c0, %c0_0] : memref<256x48xbf16, #tpu.memory_space<vmem>>, vector<256x48xbf16>
    %c0_1 = arith.constant 0 : index
    %c0_2 = arith.constant 0 : index
    %1 = vector.load %arg2[%c0_1, %c0_2] : memref<48x128xbf16, #tpu.memory_space<vmem>>, vector<48x128xbf16>
    %cst = arith.constant dense<0.000000e+00> : vector<256x128xf32>
    %2 = tpu.matmul %0, %1, %cst {dimension_numbers = #tpu.dot_dimension_numbers<[1], [0], [0], [1], [0, 0, 1, 1], [], []>} : vector<256x48xbf16>, vector<48x128xbf16>, vector<256x128xf32> -> vector<256x128xf32>
    %c0_3 = arith.constant 0 : index
    %c0_4 = arith.constant 0 : index
    %3 = vector.load %arg3[%c0_3, %c0_4] : memref<256x128xf32, #tpu.memory_space<vmem>>, vector<256x128xf32>
    tpu.vector_store %arg3[%c0_3, %c0_4], %2 {strides = array<i32>} : memref<256x128xf32, #tpu.memory_space<vmem>>, vector<256x128xf32>,
    %cst_5 = arith.constant dense<0.000000e+00> : vector<128xf32>
    %4 = vector.multi_reduction <add>, %2, %cst_5 [0] : vector<256x128xf32> to vector<128xf32>
    %5 = vector.shape_cast %4 : vector<128xf32> to vector<1x128xf32>
    %6 = arith.mulf %2, %2 : vector<256x128xf32>
    %cst_6 = arith.constant dense<0.000000e+00> : vector<128xf32>
    %7 = vector.multi_reduction <add>, %6, %cst_6 [0] : vector<256x128xf32> to vector<128xf32>
    %8 = vector.shape_cast %7 : vector<128xf32> to vector<1x128xf32>
    %9 = tpu.iota {dimensions = array<i32: 0>} : vector<8x128xi32>
    %c0_i32 = arith.constant 0 : i32
    %10 = vector.broadcast %c0_i32 : i32 to vector<8x128xi32>
    %11 = arith.cmpi eq, %9, %10 : vector<8x128xi32>
    %c1_i32 = arith.constant 1 : i32
    %12 = vector.broadcast %c1_i32 : i32 to vector<8x128xi32>
    %13 = arith.cmpi eq, %9, %12 : vector<8x128xi32>
    %cst_7 = arith.constant 0.000000e+00 : f32
    %14 = vector.shape_cast %8 : vector<1x128xf32> to vector<1x128xf32>
    %15 = vector.broadcast %14 : vector<1x128xf32> to vector<8x128xf32>
    %16 = vector.broadcast %cst_7 : f32 to vector<8x128xf32>
    %17 = arith.select %13, %15, %16 : vector<8x128xi1>, vector<8x128xf32>
    %18 = vector.shape_cast %5 : vector<1x128xf32> to vector<1x128xf32>
    %19 = vector.broadcast %18 : vector<1x128xf32> to vector<8x128xf32>
    %20 = arith.select %11, %19, %17 : vector<8x128xi1>, vector<8x128xf32>
    %21 = vector.shape_cast %20 : vector<8x128xf32> to vector<1x8x128xf32>
    %c0_8 = arith.constant 0 : index
    %c0_9 = arith.constant 0 : index
    %c0_10 = arith.constant 0 : index
    %22 = vector.load %arg4[%c0_8, %c0_9, %c0_10] : memref<1x8x128xf32, #tpu.memory_space<vmem>>, vector<1x8x128xf32>
    tpu.vector_store %arg4[%c0_8, %c0_9, %c0_10], %21 {strides = array<i32>} : memref<1x8x128xf32, #tpu.memory_space<vmem>>, vector<1x8x128xf32>,
    return
  }
  func.func @transform_0(%arg0: i32) -> (i32, i32) {
    %c0_i32 = arith.constant 0 : i32
    %c0_i32_0 = arith.constant 0 : i32
    return %arg0, %c0_i32 : i32, i32
  }
  func.func @transform_1(%arg0: i32) -> (i32, i32) {
    %c0_i32 = arith.constant 0 : i32
    %c0_i32_0 = arith.constant 0 : i32
    %c0_i32_1 = arith.constant 0 : i32
    return %c0_i32, %c0_i32_0 : i32, i32
  }
  func.func @transform_2(%arg0: i32) -> (i32, i32) {
    %c0_i32 = arith.constant 0 : i32
    %c0_i32_0 = arith.constant 0 : i32
    return %arg0, %c0_i32 : i32, i32
  }
  func.func @transform_3(%arg0: i32) -> (i32, i32, i32) {
    %c0_i32 = arith.constant 0 : i32
    %c0_i32_0 = arith.constant 0 : i32
    %c0_i32_1 = arith.constant 0 : i32
    return %arg0, %c0_i32, %c0_i32_0 : i32, i32, i32
  }
}

module attributes {stable_mosaic.version = 11 : i64} {
  func.func @bn_relu_kernel(%arg0: i32, %arg1: memref<256x128xf32, #tpu.memory_space<vmem>>, %arg2: memref<1x128xf32, #tpu.memory_space<vmem>>, %arg3: memref<1x128xf32, #tpu.memory_space<vmem>>, %arg4: memref<256x128xbf16, #tpu.memory_space<vmem>>) attributes {dimension_semantics = [#tpu.dimension_semantics<parallel>], iteration_bounds = array<i64: 2>, scalar_prefetch = 0 : i64, scratch_operands = 0 : i64, tpu.core_type = #tpu.core_type<tc>, window_params = [{transform_indices = @transform_0, window_bounds = array<i64: 256, 128>}, {pipeline_mode = #tpu.pipeline_mode<synchronous>, transform_indices = @transform_1, window_bounds = array<i64: 1, 128>}, {pipeline_mode = #tpu.pipeline_mode<synchronous>, transform_indices = @transform_2, window_bounds = array<i64: 1, 128>}, {transform_indices = @transform_3, window_bounds = array<i64: 256, 128>}]} {
    %c0 = arith.constant 0 : index
    %c0_0 = arith.constant 0 : index
    %0 = vector.load %arg1[%c0, %c0_0] : memref<256x128xf32, #tpu.memory_space<vmem>>, vector<256x128xf32>
    %c0_1 = arith.constant 0 : index
    %c0_2 = arith.constant 0 : index
    %1 = vector.load %arg2[%c0_1, %c0_2] : memref<1x128xf32, #tpu.memory_space<vmem>>, vector<1x128xf32>
    %2 = vector.broadcast %1 : vector<1x128xf32> to vector<256x128xf32>
    %3 = arith.mulf %0, %2 : vector<256x128xf32>
    %c0_3 = arith.constant 0 : index
    %c0_4 = arith.constant 0 : index
    %4 = vector.load %arg3[%c0_3, %c0_4] : memref<1x128xf32, #tpu.memory_space<vmem>>, vector<1x128xf32>
    %5 = vector.broadcast %4 : vector<1x128xf32> to vector<256x128xf32>
    %6 = arith.addf %3, %5 : vector<256x128xf32>
    %cst = arith.constant 0.000000e+00 : f32
    %7 = vector.broadcast %cst : f32 to vector<256x128xf32>
    %8 = arith.maximumf %6, %7 : vector<256x128xf32>
    %9 = arith.truncf %8 : vector<256x128xf32> to vector<256x128xbf16>
    %c0_5 = arith.constant 0 : index
    %c0_6 = arith.constant 0 : index
    %10 = vector.load %arg4[%c0_5, %c0_6] : memref<256x128xbf16, #tpu.memory_space<vmem>>, vector<256x128xbf16>
    tpu.vector_store %arg4[%c0_5, %c0_6], %9 {strides = array<i32>} : memref<256x128xbf16, #tpu.memory_space<vmem>>, vector<256x128xbf16>,
    return
  }
  func.func @transform_0(%arg0: i32) -> (i32, i32) {
    %c0_i32 = arith.constant 0 : i32
    %c0_i32_0 = arith.constant 0 : i32
    return %arg0, %c0_i32 : i32, i32
  }
  func.func @transform_1(%arg0: i32) -> (i32, i32) {
    %c0_i32 = arith.constant 0 : i32
    %c0_i32_0 = arith.constant 0 : i32
    %c0_i32_1 = arith.constant 0 : i32
    return %c0_i32, %c0_i32_0 : i32, i32
  }
  func.func @transform_2(%arg0: i32) -> (i32, i32) {
    %c0_i32 = arith.constant 0 : i32
    %c0_i32_0 = arith.constant 0 : i32
    %c0_i32_1 = arith.constant 0 : i32
    return %c0_i32, %c0_i32_0 : i32, i32
  }
  func.func @transform_3(%arg0: i32) -> (i32, i32) {
    %c0_i32 = arith.constant 0 : i32
    %c0_i32_0 = arith.constant 0 : i32
    return %arg0, %c0_i32 : i32, i32
  }
}

module attributes {stable_mosaic.version = 11 : i64} {
  func.func @conv2_stats_kernel(%arg0: i32, %arg1: memref<256x48xbf16, #tpu.memory_space<vmem>>, %arg2: memref<256x80xbf16, #tpu.memory_space<vmem>>, %arg3: memref<48x128xbf16, #tpu.memory_space<vmem>>, %arg4: memref<80x128xbf16, #tpu.memory_space<vmem>>, %arg5: memref<256x128xf32, #tpu.memory_space<vmem>>, %arg6: memref<1x8x128xf32, #tpu.memory_space<vmem>>) attributes {dimension_semantics = [#tpu.dimension_semantics<parallel>], iteration_bounds = array<i64: 2>, scalar_prefetch = 0 : i64, scratch_operands = 0 : i64, tpu.core_type = #tpu.core_type<tc>, window_params = [{transform_indices = @transform_0, window_bounds = array<i64: 256, 48>}, {transform_indices = @transform_1, window_bounds = array<i64: 256, 80>}, {pipeline_mode = #tpu.pipeline_mode<synchronous>, transform_indices = @transform_2, window_bounds = array<i64: 48, 128>}, {pipeline_mode = #tpu.pipeline_mode<synchronous>, transform_indices = @transform_3, window_bounds = array<i64: 80, 128>}, {transform_indices = @transform_4, window_bounds = array<i64: 256, 128>}, {transform_indices = @transform_5, window_bounds = array<i64: 1, 8, 128>}]} {
    %c0 = arith.constant 0 : index
    %c0_0 = arith.constant 0 : index
    %0 = vector.load %arg1[%c0, %c0_0] : memref<256x48xbf16, #tpu.memory_space<vmem>>, vector<256x48xbf16>
    %c0_1 = arith.constant 0 : index
    %c0_2 = arith.constant 0 : index
    %1 = vector.load %arg3[%c0_1, %c0_2] : memref<48x128xbf16, #tpu.memory_space<vmem>>, vector<48x128xbf16>
    %cst = arith.constant dense<0.000000e+00> : vector<256x128xf32>
    %2 = tpu.matmul %0, %1, %cst {dimension_numbers = #tpu.dot_dimension_numbers<[1], [0], [0], [1], [0, 0, 1, 1], [], []>} : vector<256x48xbf16>, vector<48x128xbf16>, vector<256x128xf32> -> vector<256x128xf32>
    %c0_3 = arith.constant 0 : index
    %c0_4 = arith.constant 0 : index
    %3 = vector.load %arg2[%c0_3, %c0_4] : memref<256x80xbf16, #tpu.memory_space<vmem>>, vector<256x80xbf16>
    %c0_5 = arith.constant 0 : index
    %c0_6 = arith.constant 0 : index
    %4 = vector.load %arg4[%c0_5, %c0_6] : memref<80x128xbf16, #tpu.memory_space<vmem>>, vector<80x128xbf16>
    %cst_7 = arith.constant dense<0.000000e+00> : vector<256x128xf32>
    %5 = tpu.matmul %3, %4, %cst_7 {dimension_numbers = #tpu.dot_dimension_numbers<[1], [0], [0], [1], [0, 0, 1, 1], [], []>} : vector<256x80xbf16>, vector<80x128xbf16>, vector<256x128xf32> -> vector<256x128xf32>
    %6 = arith.addf %2, %5 : vector<256x128xf32>
    %c0_8 = arith.constant 0 : index
    %c0_9 = arith.constant 0 : index
    %7 = vector.load %arg5[%c0_8, %c0_9] : memref<256x128xf32, #tpu.memory_space<vmem>>, vector<256x128xf32>
    tpu.vector_store %arg5[%c0_8, %c0_9], %6 {strides = array<i32>} : memref<256x128xf32, #tpu.memory_space<vmem>>, vector<256x128xf32>,
    %cst_10 = arith.constant dense<0.000000e+00> : vector<128xf32>
    %8 = vector.multi_reduction <add>, %6, %cst_10 [0] : vector<256x128xf32> to vector<128xf32>
    %9 = vector.shape_cast %8 : vector<128xf32> to vector<1x128xf32>
    %10 = arith.mulf %6, %6 : vector<256x128xf32>
    %cst_11 = arith.constant dense<0.000000e+00> : vector<128xf32>
    %11 = vector.multi_reduction <add>, %10, %cst_11 [0] : vector<256x128xf32> to vector<128xf32>
    %12 = vector.shape_cast %11 : vector<128xf32> to vector<1x128xf32>
    %13 = tpu.iota {dimensions = array<i32: 0>} : vector<8x128xi32>
    %c0_i32 = arith.constant 0 : i32
    %14 = vector.broadcast %c0_i32 : i32 to vector<8x128xi32>
    %15 = arith.cmpi eq, %13, %14 : vector<8x128xi32>
    %c1_i32 = arith.constant 1 : i32
    %16 = vector.broadcast %c1_i32 : i32 to vector<8x128xi32>
    %17 = arith.cmpi eq, %13, %16 : vector<8x128xi32>
    %cst_12 = arith.constant 0.000000e+00 : f32
    %18 = vector.shape_cast %12 : vector<1x128xf32> to vector<1x128xf32>
    %19 = vector.broadcast %18 : vector<1x128xf32> to vector<8x128xf32>
    %20 = vector.broadcast %cst_12 : f32 to vector<8x128xf32>
    %21 = arith.select %17, %19, %20 : vector<8x128xi1>, vector<8x128xf32>
    %22 = vector.shape_cast %9 : vector<1x128xf32> to vector<1x128xf32>
    %23 = vector.broadcast %22 : vector<1x128xf32> to vector<8x128xf32>
    %24 = arith.select %15, %23, %21 : vector<8x128xi1>, vector<8x128xf32>
    %25 = vector.shape_cast %24 : vector<8x128xf32> to vector<1x8x128xf32>
    %c0_13 = arith.constant 0 : index
    %c0_14 = arith.constant 0 : index
    %c0_15 = arith.constant 0 : index
    %26 = vector.load %arg6[%c0_13, %c0_14, %c0_15] : memref<1x8x128xf32, #tpu.memory_space<vmem>>, vector<1x8x128xf32>
    tpu.vector_store %arg6[%c0_13, %c0_14, %c0_15], %25 {strides = array<i32>} : memref<1x8x128xf32, #tpu.memory_space<vmem>>, vector<1x8x128xf32>,
    return
  }
  func.func @transform_0(%arg0: i32) -> (i32, i32) {
    %c0_i32 = arith.constant 0 : i32
    %c0_i32_0 = arith.constant 0 : i32
    return %arg0, %c0_i32 : i32, i32
  }
  func.func @transform_1(%arg0: i32) -> (i32, i32) {
    %c0_i32 = arith.constant 0 : i32
    %c0_i32_0 = arith.constant 0 : i32
    return %arg0, %c0_i32 : i32, i32
  }
  func.func @transform_2(%arg0: i32) -> (i32, i32) {
    %c0_i32 = arith.constant 0 : i32
    %c0_i32_0 = arith.constant 0 : i32
    %c0_i32_1 = arith.constant 0 : i32
    return %c0_i32, %c0_i32_0 : i32, i32
  }
  func.func @transform_3(%arg0: i32) -> (i32, i32) {
    %c0_i32 = arith.constant 0 : i32
    %c0_i32_0 = arith.constant 0 : i32
    %c0_i32_1 = arith.constant 0 : i32
    return %c0_i32, %c0_i32_0 : i32, i32
  }
  func.func @transform_4(%arg0: i32) -> (i32, i32) {
    %c0_i32 = arith.constant 0 : i32
    %c0_i32_0 = arith.constant 0 : i32
    return %arg0, %c0_i32 : i32, i32
  }
  func.func @transform_5(%arg0: i32) -> (i32, i32, i32) {
    %c0_i32 = arith.constant 0 : i32
    %c0_i32_0 = arith.constant 0 : i32
    %c0_i32_1 = arith.constant 0 : i32
    return %arg0, %c0_i32, %c0_i32_0 : i32, i32, i32
  }
}

module attributes {stable_mosaic.version = 11 : i64} {
  func.func @bn_relu_kernel(%arg0: i32, %arg1: memref<256x128xf32, #tpu.memory_space<vmem>>, %arg2: memref<1x128xf32, #tpu.memory_space<vmem>>, %arg3: memref<1x128xf32, #tpu.memory_space<vmem>>, %arg4: memref<256x128xf32, #tpu.memory_space<vmem>>) attributes {dimension_semantics = [#tpu.dimension_semantics<parallel>], iteration_bounds = array<i64: 2>, scalar_prefetch = 0 : i64, scratch_operands = 0 : i64, tpu.core_type = #tpu.core_type<tc>, window_params = [{transform_indices = @transform_0, window_bounds = array<i64: 256, 128>}, {pipeline_mode = #tpu.pipeline_mode<synchronous>, transform_indices = @transform_1, window_bounds = array<i64: 1, 128>}, {pipeline_mode = #tpu.pipeline_mode<synchronous>, transform_indices = @transform_2, window_bounds = array<i64: 1, 128>}, {transform_indices = @transform_3, window_bounds = array<i64: 256, 128>}]} {
    %c0 = arith.constant 0 : index
    %c0_0 = arith.constant 0 : index
    %0 = vector.load %arg1[%c0, %c0_0] : memref<256x128xf32, #tpu.memory_space<vmem>>, vector<256x128xf32>
    %c0_1 = arith.constant 0 : index
    %c0_2 = arith.constant 0 : index
    %1 = vector.load %arg2[%c0_1, %c0_2] : memref<1x128xf32, #tpu.memory_space<vmem>>, vector<1x128xf32>
    %2 = vector.broadcast %1 : vector<1x128xf32> to vector<256x128xf32>
    %3 = arith.mulf %0, %2 : vector<256x128xf32>
    %c0_3 = arith.constant 0 : index
    %c0_4 = arith.constant 0 : index
    %4 = vector.load %arg3[%c0_3, %c0_4] : memref<1x128xf32, #tpu.memory_space<vmem>>, vector<1x128xf32>
    %5 = vector.broadcast %4 : vector<1x128xf32> to vector<256x128xf32>
    %6 = arith.addf %3, %5 : vector<256x128xf32>
    %cst = arith.constant 0.000000e+00 : f32
    %7 = vector.broadcast %cst : f32 to vector<256x128xf32>
    %8 = arith.maximumf %6, %7 : vector<256x128xf32>
    %c0_5 = arith.constant 0 : index
    %c0_6 = arith.constant 0 : index
    %9 = vector.load %arg4[%c0_5, %c0_6] : memref<256x128xf32, #tpu.memory_space<vmem>>, vector<256x128xf32>
    tpu.vector_store %arg4[%c0_5, %c0_6], %8 {strides = array<i32>} : memref<256x128xf32, #tpu.memory_space<vmem>>, vector<256x128xf32>,
    return
  }
  func.func @transform_0(%arg0: i32) -> (i32, i32) {
    %c0_i32 = arith.constant 0 : i32
    %c0_i32_0 = arith.constant 0 : i32
    return %arg0, %c0_i32 : i32, i32
  }
  func.func @transform_1(%arg0: i32) -> (i32, i32) {
    %c0_i32 = arith.constant 0 : i32
    %c0_i32_0 = arith.constant 0 : i32
    %c0_i32_1 = arith.constant 0 : i32
    return %c0_i32, %c0_i32_0 : i32, i32
  }
  func.func @transform_2(%arg0: i32) -> (i32, i32) {
    %c0_i32 = arith.constant 0 : i32
    %c0_i32_0 = arith.constant 0 : i32
    %c0_i32_1 = arith.constant 0 : i32
    return %c0_i32, %c0_i32_0 : i32, i32
  }
  func.func @transform_3(%arg0: i32) -> (i32, i32) {
    %c0_i32 = arith.constant 0 : i32
    %c0_i32_0 = arith.constant 0 : i32
    return %arg0, %c0_i32 : i32, i32
  }
}

</mosaic_0001>

<bundles_post_ra>
// kernel: conv_block_forward.5
= control target key start
LH: loop header
LB: loop body
LE: loop exit
PB: predicated region body
PF: predicated region fallthrough
CT: control target
= control target key end

     0   :  { %s740_s12 = smov 0   ;;  %s887_s0 = inlined_call_operand.vmem [shape: f32[512,128], index: 0, kind: input, shape index: {}]   ;;  %s888_s1 = inlined_call_operand.vmem [shape: f32[1,128], index: 1, kind: input, shape index: {}]   ;;  %s889_s2 = inlined_call_operand.vmem [shape: f32[1,128], index: 2, kind: input, shape index: {}]   ;;  %s890_s3 = inlined_call_operand.vmem [shape: bf16[512,128], index: 3, kind: output, shape index: {}]  }
   0x1 LB: > { %s532_s13 = sadd.s32 4294967295, %s718_s12   ;;  %p536_p0 = scmp.ge.s32.totalorder %s718_s12, 1  ;;  %s718_s12 = sphi %s740_s12, %s13_s12  }
   0x2   : > { %p138_p1 = scmp.lt.s32.totalorder %s718_s12, 3 }
   0x4   : > { %p139_p2 = pnand %p536_p0, %p138_p1 }
   0x5   : > { %s537_s14 = sshll.u32 (!%p139_p2), %s532_s13, 5 }
   0x6   : > { %142 = sbr.rel (%p139_p2) target bundleno = 49 (0x31), region = 32  ;;  %p163_p3 = scmp.lt.s32.totalorder (!%p139_p2), %s537_s14, 63 }
   0xb   : > { %s892_s14 = smov (!%p163_p3, %s537_s14), 63  ;;  %v754_v0 = vld [vmem:[%s888_s1] ss:$0 sm:$0xff] }
   0xc   : > { %s538_s15 = sshll.u32 %s892_s14, 3  ;;  %v764_v1 = vld [vmem:[%s889_s2] ss:$0 sm:$0xff]  ;;  %s540_s23 = sshll.u32 %s892_s14, 2 }
   0xd   : > { %s759_s20 = scalar_lea.vmem %s887_s0, %s538_s15  ;;  %s796_s26 = scalar_lea.vmem %s890_s3, %s540_s23 }
   0xe   : > { %v174_v2 = vld [vmem:[%s759_s20] sm:$0xff]  ;;  %v175_v3 = vld [vmem:[%s759_s20 + $0x8] sm:$0xff]  ;;  %v176_v4 = vld [vmem:[%s759_s20 + $0x10] sm:$0xff] }
   0xf   : > { %v213_v5 = vmul.f32 %v754_v0, %v174_v2  ;;  %v214_v6 = vmul.f32 %v754_v0, %v175_v3  ;;  %v177_v7 = vld [vmem:[%s759_s20 + $0x18] sm:$0xff]  ;;  %v215_v8 = vmul.f32 %v754_v0, %v176_v4  ;;  %v178_v9 = vld [vmem:[%s759_s20 + $0x20] sm:$0xff]  ;;  %v179_v10 = vld [vmem:[%s759_s20 + $0x28] sm:$0xff] }
  0x10   : > { %v216_v11 = vmul.f32 %v754_v0, %v177_v7  ;;  %v217_v12 = vmul.f32 %v754_v0, %v178_v9  ;;  %v218_v13 = vmul.f32 %v754_v0, %v179_v10  ;;  %v180_v14 = vld [vmem:[%s759_s20 + $0x30] sm:$0xff]  ;;  %v181_v15 = vld [vmem:[%s759_s20 + $0x38] sm:$0xff]  ;;  %v182_v24 = vld [vmem:[%s759_s20 + $0x40] sm:$0xff] }
  0x11   : > { %v252_v16 = vadd.f32 %v764_v1, %v213_v5  ;;  %v253_v17 = vadd.f32 %v764_v1, %v214_v6  ;;  %v254_v18 = vadd.f32 %v764_v1, %v215_v8  ;;  %v219_v19 = vmul.f32 %v754_v0, %v180_v14  ;;  %v183_v25 = vld [vmem:[%s759_s20 + $0x48] sm:$0xff]  ;;  %v184_v30 = vld [vmem:[%s759_s20 + $0x50] sm:$0xff]  ;;  %v185_v35 = vld [vmem:[%s759_s20 + $0x58] sm:$0xff] }
  0x12   : > { %v255_v20 = vadd.f32 %v764_v1, %v216_v11  ;;  %v256_v21 = vadd.f32 %v764_v1, %v217_v12  ;;  %v257_v22 = vadd.f32 %v764_v1, %v218_v13  ;;  %v220_v23 = vmul.f32 %v754_v0, %v181_v15  ;;  %v186_v36 = vld [vmem:[%s759_s20 + $0x60] sm:$0xff]  ;;  %v187_v41 = vld [vmem:[%s759_s20 + $0x68] sm:$0xff]  ;;  %v188_v42 = vld [vmem:[%s759_s20 + $0x70] sm:$0xff] }
  0x13   : > { %v284_v26 = vmax.f32 %v252_v16, 0.0  ;;  %v285_v27 = vmax.f32 %v253_v17, 0.0  ;;  %v286_v28 = vmax.f32 %v254_v18, 0.0  ;;  %v258_v29 = vadd.f32 %v764_v1, %v219_v19  ;;  %v189_v51 = vld [vmem:[%s759_s20 + $0x78] sm:$0xff]  ;;  %v190_v56 = vld [vmem:[%s759_s20 + $0x80] sm:$0xff]  ;;  %v191_v61 = vld [vmem:[%s759_s20 + $0x88] sm:$0xff] }
  0x14   : > { %v287_v31 = vmax.f32 %v255_v20, 0.0  ;;  %v288_v32 = vmax.f32 %v256_v21, 0.0  ;;  %v289_v33 = vmax.f32 %v257_v22, 0.0  ;;  %v259_v34 = vadd.f32 %v764_v1, %v220_v23  ;;  %v192_v4 = vld [vmem:[%s759_s20 + $0x90] sm:$0xff]  ;;  %v193_v5 = vld [vmem:[%s759_s20 + $0x98] sm:$0xff]  ;;  %v194_v10 = vld [vmem:[%s759_s20 + $0xa0] sm:$0xff] }
  0x15   : > { %v612_v37 = vpack.c.bf16 %v285_v27, %v284_v26  ;;  %v290_v38 = vmax.f32 %v258_v29, 0.0  ;;  %v221_v39 = vmul.f32 %v754_v0, %v182_v24  ;;  %v222_v40 = vmul.f32 %v754_v0, %v183_v25  ;;  %v195_v15 = vld [vmem:[%s759_s20 + $0xa8] sm:$0xff]  ;;  %v196_v20 = vld [vmem:[%s759_s20 + $0xb0] sm:$0xff]  ;;  %v197_v25 = vld [vmem:[%s759_s20 + $0xb8] sm:$0xff] }
  0x16   : > { %v617_v43 = vpack.c.bf16 %v287_v31, %v286_v28  ;;  %v622_v44 = vpack.c.bf16 %v289_v33, %v288_v32  ;;  %v291_v45 = vmax.f32 %v259_v34, 0.0  ;;  %v223_v46 = vmul.f32 %v754_v0, %v184_v30  ;;  %v198_v30 = vld [vmem:[%s759_s20 + $0xc0] sm:$0xff] }
  0x17   : > { %613 = vst [vmem:[%s796_s26] sm:$0xff] %v612_v37   ;;  %v260_v47 = vadd.f32 %v764_v1, %v221_v39  ;;  %v261_v48 = vadd.f32 %v764_v1, %v222_v40  ;;  %v224_v49 = vmul.f32 %v754_v0, %v185_v35  ;;  %v225_v50 = vmul.f32 %v754_v0, %v186_v36  ;;  %v199_v35 = vld [vmem:[%s759_s20 + $0xc8] sm:$0xff]  ;;  %v200_v40 = vld [vmem:[%s759_s20 + $0xd0] sm:$0xff] }
  0x18   : > { %689 = vst [vmem:[%s796_s26 + $0x8] sm:$0xff] %v617_v43   ;;  %690 = vst [vmem:[%s796_s26 + $0x10] sm:$0xff] %v622_v44   ;;  %v627_v52 = vpack.c.bf16 %v291_v45, %v290_v38  ;;  %v262_v53 = vadd.f32 %v764_v1, %v223_v46  ;;  %v226_v54 = vmul.f32 %v754_v0, %v187_v41  ;;  %v201_v41 = vld [vmem:[%s759_s20 + $0xd8] sm:$0xff]  ;;  %v202_v46 = vld [vmem:[%s759_s20 + $0xe0] sm:$0xff] }
  0x19   : > { %v227_v55 = vmul.f32 %v754_v0, %v188_v42  ;;  %v292_v57 = vmax.f32 %v260_v47, 0.0  ;;  %v293_v58 = vmax.f32 %v261_v48, 0.0  ;;  %v263_v59 = vadd.f32 %v764_v1, %v224_v49 }
  0x1a   : > { %v264_v60 = vadd.f32 %v764_v1, %v225_v50  ;;  %691 = vst [vmem:[%s796_s26 + $0x18] sm:$0xff] %v627_v52   ;;  %v294_v62 = vmax.f32 %v262_v53, 0.0  ;;  %v265_v63 = vadd.f32 %v764_v1, %v226_v54  ;;  %v228_v2 = vmul.f32 %v754_v0, %v189_v51  ;;  %v203_v51 = vld [vmem:[%s759_s20 + $0xe8] sm:$0xff] }
  0x1b   : > { %v266_v3 = vadd.f32 %v764_v1, %v227_v55  ;;  %v632_v6 = vpack.c.bf16 %v293_v58, %v292_v57  ;;  %v295_v7 = vmax.f32 %v263_v59, 0.0  ;;  %v229_v9 = vmul.f32 %v754_v0, %v190_v56  ;;  %v204_v56 = vld [vmem:[%s759_s20 + $0xf0] sm:$0xff] }
  0x1c   : > { %v296_v8 = vmax.f32 %v264_v60, 0.0  ;;  %v297_v11 = vmax.f32 %v265_v63, 0.0  ;;  %v267_v12 = vadd.f32 %v764_v1, %v228_v2  ;;  %v230_v14 = vmul.f32 %v754_v0, %v191_v61  ;;  %v205_v61 = vld [vmem:[%s759_s20 + $0xf8] sm:$0xff] }
  0x1d   : > { %v298_v13 = vmax.f32 %v266_v3, 0.0  ;;  %692 = vst [vmem:[%s796_s26 + $0x20] sm:$0xff] %v632_v6   ;;  %v637_v16 = vpack.c.bf16 %v295_v7, %v294_v62  ;;  %v268_v17 = vadd.f32 %v764_v1, %v229_v9  ;;  %v231_v18 = vmul.f32 %v754_v0, %v192_v4 }
  0x1e   : > { %v232_v19 = vmul.f32 %v754_v0, %v193_v5  ;;  %v642_v21 = vpack.c.bf16 %v297_v11, %v296_v8  ;;  %v299_v22 = vmax.f32 %v267_v12, 0.0  ;;  %v269_v23 = vadd.f32 %v764_v1, %v230_v14 }
  0x1f   : > { %v233_v24 = vmul.f32 %v754_v0, %v194_v10  ;;  %693 = vst [vmem:[%s796_s26 + $0x28] sm:$0xff] %v637_v16   ;;  %v300_v26 = vmax.f32 %v268_v17, 0.0  ;;  %v270_v27 = vadd.f32 %v764_v1, %v231_v18  ;;  %v234_v29 = vmul.f32 %v754_v0, %v195_v15 }
  0x20   : > { %v271_v28 = vadd.f32 %v764_v1, %v232_v19  ;;  %694 = vst [vmem:[%s796_s26 + $0x30] sm:$0xff] %v642_v21   ;;  %v647_v31 = vpack.c.bf16 %v299_v22, %v298_v13  ;;  %v301_v32 = vmax.f32 %v269_v23, 0.0  ;;  %v235_v34 = vmul.f32 %v754_v0, %v196_v20 }
  0x21   : > { %v272_v33 = vadd.f32 %v764_v1, %v233_v24  ;;  %v302_v36 = vmax.f32 %v270_v27, 0.0  ;;  %v273_v38 = vadd.f32 %v764_v1, %v234_v29  ;;  %v236_v39 = vmul.f32 %v754_v0, %v197_v25 }
  0x22   : > { %v303_v37 = vmax.f32 %v271_v28, 0.0  ;;  %695 = vst [vmem:[%s796_s26 + $0x38] sm:$0xff] %v647_v31   ;;  %v652_v42 = vpack.c.bf16 %v301_v32, %v300_v26  ;;  %v274_v44 = vadd.f32 %v764_v1, %v235_v34  ;;  %v237_v45 = vmul.f32 %v754_v0, %v198_v30 }
  0x23   : > { %v304_v43 = vmax.f32 %v272_v33, 0.0  ;;  %v305_v48 = vmax.f32 %v273_v38, 0.0  ;;  %v275_v49 = vadd.f32 %v764_v1, %v236_v39  ;;  %v238_v50 = vmul.f32 %v754_v0, %v199_v35 }
  0x24   : > { %v657_v47 = vpack.c.bf16 %v303_v37, %v302_v36  ;;  %696 = vst [vmem:[%s796_s26 + $0x40] sm:$0xff] %v652_v42   ;;  %v306_v52 = vmax.f32 %v274_v44, 0.0  ;;  %v276_v53 = vadd.f32 %v764_v1, %v237_v45  ;;  %v239_v54 = vmul.f32 %v754_v0, %v200_v40 }
  0x25   : > { %v240_v55 = vmul.f32 %v754_v0, %v201_v41  ;;  %v662_v57 = vpack.c.bf16 %v305_v48, %v304_v43  ;;  %v307_v58 = vmax.f32 %v275_v49, 0.0  ;;  %v277_v59 = vadd.f32 %v764_v1, %v238_v50 }
  0x26   : > { %697 = vst [vmem:[%s796_s26 + $0x48] sm:$0xff] %v657_v47   ;;  %v241_v60 = vmul.f32 %v754_v0, %v202_v46  ;;  %v308_v62 = vmax.f32 %v276_v53, 0.0  ;;  %v278_v63 = vadd.f32 %v764_v1, %v239_v54  ;;  %v242_v3 = vmul.f32 %v754_v0, %v203_v51 }
  0x27   : > { %v279_v2 = vadd.f32 %v764_v1, %v240_v55  ;;  %698 = vst [vmem:[%s796_s26 + $0x50] sm:$0xff] %v662_v57   ;;  %v667_v4 = vpack.c.bf16 %v307_v58, %v306_v52  ;;  %v309_v5 = vmax.f32 %v277_v59, 0.0  ;;  %v243_v7 = vmul.f32 %v754_v0, %v204_v56 }
  0x28   : > { %v280_v6 = vadd.f32 %v764_v1, %v241_v60  ;;  %v310_v8 = vmax.f32 %v278_v63, 0.0  ;;  %v281_v10 = vadd.f32 %v764_v1, %v242_v3  ;;  %v244_v11 = vmul.f32 %v754_v0, %v205_v61 }
  0x29   : > { %v311_v9 = vmax.f32 %v279_v2, 0.0  ;;  %699 = vst [vmem:[%s796_s26 + $0x58] sm:$0xff] %v667_v4   ;;  %v672_v12 = vpack.c.bf16 %v309_v5, %v308_v62  ;;  %v282_v14 = vadd.f32 %v764_v1, %v243_v7 }
  0x2a   : > { %v312_v13 = vmax.f32 %v280_v6, 0.0  ;;  %v313_v16 = vmax.f32 %v281_v10, 0.0  ;;  %v283_v17 = vadd.f32 %v764_v1, %v244_v11 }
  0x2b   : > { %v677_v15 = vpack.c.bf16 %v311_v9, %v310_v8  ;;  %700 = vst [vmem:[%s796_s26 + $0x60] sm:$0xff] %v672_v12   ;;  %v314_v18 = vmax.f32 %v282_v14, 0.0 }
  0x2c   : > { %v682_v19 = vpack.c.bf16 %v313_v16, %v312_v13  ;;  %v315_v20 = vmax.f32 %v283_v17, 0.0 }
  0x2d   : > { %701 = vst [vmem:[%s796_s26 + $0x68] sm:$0xff] %v677_v15  }
  0x2e   : > { %702 = vst [vmem:[%s796_s26 + $0x70] sm:$0xff] %v682_v19   ;;  %v687_v21 = vpack.c.bf16 %v315_v20, %v314_v18 }
  0x30   : > { %703 = vst [vmem:[%s796_s26 + $0x78] sm:$0xff] %v687_v21  }
  0x31 PF: > { %s13_s12 = sadd.s32 1, %s718_s12  }
  0x32   : > { %p10_p4 = scmp.ge.s32.totalorder %s13_s12, 4  }
  0x34   :  { %12 = sbr.rel (!%p10_p4) target bundleno = 1 (0x1), region = 62 }

// kernel: conv_block_forward.4
= control target key start
LH: loop header
LB: loop body
LE: loop exit
PB: predicated region body
PF: predicated region fallthrough
CT: control target
= control target key end

     0   :  { %s929_s12 = smov 0   ;;  %s1107_s0 = inlined_call_operand.vmem [shape: bf16[512,48], index: 0, kind: input, shape index: {}]   ;;  %s1108_s1 = inlined_call_operand.vmem [shape: bf16[48,128], index: 1, kind: input, shape index: {}]   ;;  %s1109_s2 = inlined_call_operand.vmem [shape: f32[512,128], index: 2, kind: output, shape index: {0}]   ;;  %s1110_s3 = inlined_call_operand.vmem [shape: f32[2,8,128], index: 3, kind: output, shape index: {1}]  }
   0x1 LB: > { %s935_s13 = sadd.s32 4294967295, %s907_s12   ;;  %p768_p0 = scmp.ge.s32.totalorder %s907_s12, 1  ;;  %s907_s12 = sphi %s929_s12, %s14_s12  }
   0x2   : > { %p141_p1 = scmp.lt.s32.totalorder %s907_s12, 3 }
   0x4   : > { %p142_p2 = pnand %p768_p0, %p141_p1 }
   0x5   : > { %s769_s16 = sshll.u32 (!%p142_p2), %s935_s13, 5  ;;  %p181_p4 = scmp.lt.s32.totalorder (!%p142_p2), %s935_s13, 1 }
   0x6   : > { %145 = sbr.rel (%p142_p2) target bundleno = 302 (0x12e), region = 28  ;;  %p170_p3 = scmp.lt.s32.totalorder (!%p142_p2), %s769_s16, 63 }
   0xb   : > { %v882_v0 = vld [vmem:[%s1108_s1 + $0x10] sm:$0xff]   ;;  %v883_v1 = vld [vmem:[%s1108_s1 + $0x8] sm:$0xff]   ;;  %s1112_s16 = smov (!%p170_p3, %s769_s16), 63  ;;  %v884_v2 = vld [vmem:[%s1108_s1] sm:$0xff]   ;;  %vm322_vm0 = vcmask 392192   ;;  %s1114_s13 = smov (!%p181_p4, %s935_s13), 1 }
   0xc   : > { %830 = vmatprep.subr.bf16.mxu0 %v882_v0  ;;  %868 = vmatprep.subr.bf16.mxu1 %v882_v0  ;;  %s770_s21 = sshll.u32 %s1112_s16, 2  ;;  %s772_s25 = sshll.u32 %s1112_s16, 3 }
   0xd   : > { %831 = vmatpush3.bf16.msra.mxu0 %v882_v0  ;;  %871 = vmatpush3.bf16.msra.mxu1 %v882_v0  ;;  %s955_s24 = scalar_lea.vmem %s1107_s0, %s770_s21  ;;  %s993_s28 = scalar_lea.vmem %s1109_s2, %s772_s25 }
   0xe   : > { %832 = vmatprep.subr.bf16.mxu0 %v883_v1  ;;  %869 = vmatprep.subr.bf16.mxu1 %v883_v1  ;;  %v885_v3 = vld [vmem:[%s955_s24] sm:$0xff]   ;;  %v886_v4 = vld [vmem:[%s955_s24 + $0x8] sm:$0xff]   ;;  %v887_v5 = vld [vmem:[%s955_s24 + $0x10] sm:$0xff]   ;;  %s773_s29 = sshll.u32 %s1114_s13, 3 }
   0xf   : > { %836 = vmatprep.mubr.msk.bf16.mxu0 %vm322_vm0, %v885_v3  ;;  %v893_v6 = vld [vmem:[%s955_s24 + $0x40] sm:$0xff]   ;;  %v894_v7 = vld [vmem:[%s955_s24 + $0x48] sm:$0xff]   ;;  %v895_v8 = vld [vmem:[%s955_s24 + $0x50] sm:$0xff]   ;;  %s184_s5 = scalar_lea.vmem %s1110_s3, %s773_s29 }
  0x10   : > { %852 = vmatprep.mubr.msk.bf16.mxu1 %vm322_vm0, %v893_v6  ;;  %v888_v9 = vld [vmem:[%s955_s24 + $0x18] sm:$0xff]   ;;  %v889_v10 = vld [vmem:[%s955_s24 + $0x20] sm:$0xff]   ;;  %v890_v13 = vld [vmem:[%s955_s24 + $0x28] sm:$0xff]  }
  0x11   : > { %833 = vmatpush3.bf16.msra.mxu0 %v883_v1  ;;  %872 = vmatpush3.bf16.msra.mxu1 %v883_v1  ;;  %v896_v11 = vld [vmem:[%s955_s24 + $0x58] sm:$0xff]   ;;  %v897_v12 = vld [vmem:[%s955_s24 + $0x60] sm:$0xff]   ;;  %v891_v14 = vld [vmem:[%s955_s24 + $0x30] sm:$0xff]  }
  0x12   : > { %834 = vmatprep.subr.bf16.mxu0 %v884_v2  ;;  %870 = vmatprep.subr.bf16.mxu1 %v884_v2  ;;  %v898_v15 = vld [vmem:[%s955_s24 + $0x68] sm:$0xff]   ;;  %v899_v16 = vld [vmem:[%s955_s24 + $0x70] sm:$0xff]   ;;  %v892_v17 = vld [vmem:[%s955_s24 + $0x38] sm:$0xff]  }
  0x13   : > { %v900_v18 = vld [vmem:[%s955_s24 + $0x78] sm:$0xff]  }
  0x15   : > { %835 = vmatpush3.bf16.msra.mxu0 %v884_v2  ;;  %873 = vmatpush3.bf16.msra.mxu1 %v884_v2 }
  0x18   : > { %837 = vmatmul.mubr.msk.bf16.vlgmr.msra.gmra.mxu0 %vm322_vm0, %v886_v4  ;;  %853 = vmatmul.mubr.msk.bf16.vlgmr.msra.gmra.mxu1 %vm322_vm0, %v894_v7 }
  0x19   : > { %840 = vmatprep.mubr.msk.bf16.mxu0 %vm322_vm0, %v887_v5  ;;  %856 = vmatprep.mubr.msk.bf16.mxu1 %vm322_vm0, %v895_v8 }
  0x20   : > { %841 = vmatmul.mubr.msk.bf16.gmra.mxu0 %vm322_vm0, %v888_v9  ;;  %857 = vmatmul.mubr.msk.bf16.gmra.mxu1 %vm322_vm0, %v896_v11 }
  0x21   : > { %844 = vmatprep.mubr.msk.bf16.mxu0 %vm322_vm0, %v889_v10  ;;  %860 = vmatprep.mubr.msk.bf16.mxu1 %vm322_vm0, %v897_v12 }
  0x28   : > { %845 = vmatmul.mubr.msk.bf16.gmra.mxu0 %vm322_vm0, %v890_v13  ;;  %861 = vmatmul.mubr.msk.bf16.gmra.mxu1 %vm322_vm0, %v898_v15 }
  0x29   : > { %848 = vmatprep.mubr.msk.bf16.mxu0 %vm322_vm0, %v891_v14  ;;  %864 = vmatprep.mubr.msk.bf16.mxu1 %vm322_vm0, %v899_v16 }
  0x30   : > { %849 = vmatmul.mubr.msk.bf16.gmra.mxu0 %vm322_vm0, %v892_v17  ;;  %865 = vmatmul.mubr.msk.bf16.gmra.mxu1 %vm322_vm0, %v900_v18 }
  0xd8   : > { %v838_v19 = vpop.f32.mrf.mxu0  ;;  %v997_v22 = vpop.f32.mrf.mxu1 }
  0xd9   : > { %534 = vst [vmem:[%s993_s28 + $0x10] sm:$0xff] %v838_v19  ;;  %550 = vst [vmem:[%s993_s28 + $0x90] sm:$0xff] %v997_v22  ;;  %v603_v30 = vmul.f32 %v838_v19, %v838_v19 }
  0xda   : > { %v405_v20 = vpop.f32.mrf.mxu0  ;;  %v1002_v24 = vpop.f32.mrf.mxu1 }
  0xdb   : > { %532 = vst [vmem:[%s993_s28] sm:$0xff] %v405_v20  ;;  %v601_v25 = vmul.f32 %v405_v20, %v405_v20  ;;  %548 = vst [vmem:[%s993_s28 + $0x80] sm:$0xff] %v1002_v24 }
  0xdc   : > { %v839_v21 = vpop.f32.mrf.mxu0  ;;  %v1007_v29 = vpop.f32.mrf.mxu1 }
  0xdd   : > { %535 = vst [vmem:[%s993_s28 + $0x18] sm:$0xff] %v839_v21  ;;  %551 = vst [vmem:[%s993_s28 + $0x98] sm:$0xff] %v1007_v29  ;;  %v604_v35 = vmul.f32 %v839_v21, %v839_v21 }
  0xde   : > { %v408_v23 = vpop.f32.mrf.mxu0  ;;  %v1012_v34 = vpop.f32.mrf.mxu1 }
  0xdf   : > { %533 = vst [vmem:[%s993_s28 + $0x8] sm:$0xff] %v408_v23  ;;  %v564_v26 = vadd.f32 %v408_v23, %v405_v20  ;;  %v602_v27 = vmul.f32 %v408_v23, %v408_v23  ;;  %549 = vst [vmem:[%s993_s28 + $0x88] sm:$0xff] %v1012_v34 }
  0xe0   : > { %v842_v28 = vpop.f32.mrf.mxu0  ;;  %v1017_v39 = vpop.f32.mrf.mxu1 }
  0xe1   : > { %v565_v31 = vadd.f32 %v838_v19, %v564_v26  ;;  %v633_v32 = vadd.f32 %v602_v27, %v601_v25  ;;  %538 = vst [vmem:[%s993_s28 + $0x30] sm:$0xff] %v842_v28  ;;  %554 = vst [vmem:[%s993_s28 + $0xb0] sm:$0xff] %v1017_v39  ;;  %v607_v50 = vmul.f32 %v842_v28, %v842_v28 }
  0xe2   : > { %v421_v33 = vpop.f32.mrf.mxu0  ;;  %v1022_v44 = vpop.f32.mrf.mxu1 }
  0xe3   : > { %v634_v36 = vadd.f32 %v633_v32, %v603_v30  ;;  %536 = vst [vmem:[%s993_s28 + $0x20] sm:$0xff] %v421_v33  ;;  %v566_v37 = vadd.f32 %v839_v21, %v565_v31  ;;  %v605_v41 = vmul.f32 %v421_v33, %v421_v33  ;;  %552 = vst [vmem:[%s993_s28 + $0xa0] sm:$0xff] %v1022_v44 }
  0xe4   : > { %v843_v38 = vpop.f32.mrf.mxu0  ;;  %v1027_v49 = vpop.f32.mrf.mxu1 }
  0xe5   : > { %v567_v40 = vadd.f32 %v566_v37, %v421_v33  ;;  %v635_v42 = vadd.f32 %v634_v36, %v604_v35  ;;  %539 = vst [vmem:[%s993_s28 + $0x38] sm:$0xff] %v843_v38  ;;  %555 = vst [vmem:[%s993_s28 + $0xb8] sm:$0xff] %v1027_v49  ;;  %v608_v55 = vmul.f32 %v843_v38, %v843_v38 }
  0xe6   : > { %v424_v43 = vpop.f32.mrf.mxu0  ;;  %v1032_v54 = vpop.f32.mrf.mxu1  ;;  %v617_v36 = vmul.f32 %v1002_v24, %v1002_v24 }
  0xe7   : > { %v636_v45 = vadd.f32 %v635_v42, %v605_v41  ;;  %537 = vst [vmem:[%s993_s28 + $0x28] sm:$0xff] %v424_v43  ;;  %v568_v46 = vadd.f32 %v567_v40, %v424_v43  ;;  %v606_v47 = vmul.f32 %v424_v43, %v424_v43  ;;  %553 = vst [vmem:[%s993_s28 + $0xa8] sm:$0xff] %v1032_v54 }
  0xe8   : > { %v846_v48 = vpop.f32.mrf.mxu0  ;;  %v1037_v59 = vpop.f32.mrf.mxu1  ;;  %v618_v41 = vmul.f32 %v1012_v34, %v1012_v34  ;;  %v619_v43 = vmul.f32 %v997_v22, %v997_v22 }
  0xe9   : > { %v569_v51 = vadd.f32 %v842_v28, %v568_v46  ;;  %v637_v52 = vadd.f32 %v636_v45, %v606_v47  ;;  %542 = vst [vmem:[%s993_s28 + $0x50] sm:$0xff] %v846_v48  ;;  %558 = vst [vmem:[%s993_s28 + $0xd0] sm:$0xff] %v1037_v59  ;;  %v611_v6 = vmul.f32 %v846_v48, %v846_v48 }
  0xea   : > { %v437_v53 = vpop.f32.mrf.mxu0  ;;  %v1042_v0 = vpop.f32.mrf.mxu1  ;;  %v620_v47 = vmul.f32 %v1007_v29, %v1007_v29 }
  0xeb   : > { %v638_v56 = vadd.f32 %v637_v52, %v607_v50  ;;  %540 = vst [vmem:[%s993_s28 + $0x40] sm:$0xff] %v437_v53  ;;  %v570_v57 = vadd.f32 %v843_v38, %v569_v51  ;;  %v609_v61 = vmul.f32 %v437_v53, %v437_v53  ;;  %556 = vst [vmem:[%s993_s28 + $0xc0] sm:$0xff] %v1042_v0 }
  0xec   : > { %v847_v58 = vpop.f32.mrf.mxu0  ;;  %v1047_v5 = vpop.f32.mrf.mxu1  ;;  %v621_v51 = vmul.f32 %v1022_v44, %v1022_v44 }
  0xed   : > { %v571_v60 = vadd.f32 %v570_v57, %v437_v53  ;;  %v639_v62 = vadd.f32 %v638_v56, %v608_v55  ;;  %543 = vst [vmem:[%s993_s28 + $0x58] sm:$0xff] %v847_v58  ;;  %559 = vst [vmem:[%s993_s28 + $0xd8] sm:$0xff] %v1047_v5  ;;  %v612_v11 = vmul.f32 %v847_v58, %v847_v58 }
  0xee   : > { %v440_v63 = vpop.f32.mrf.mxu0  ;;  %v504_v10 = vpop.f32.mrf.mxu1  ;;  %v622_v55 = vmul.f32 %v1032_v54, %v1032_v54 }
  0xef   : > { %v640_v1 = vadd.f32 %v639_v62, %v609_v61  ;;  %541 = vst [vmem:[%s993_s28 + $0x48] sm:$0xff] %v440_v63  ;;  %v572_v2 = vadd.f32 %v571_v60, %v440_v63  ;;  %v610_v3 = vmul.f32 %v440_v63, %v440_v63  ;;  %557 = vst [vmem:[%s993_s28 + $0xc8] sm:$0xff] %v504_v10 }
  0xf0   : > { %v850_v4 = vpop.f32.mrf.mxu0  ;;  %v1054_v15 = vpop.f32.mrf.mxu1  ;;  %v625_v61 = vmul.f32 %v1042_v0, %v1042_v0 }
  0xf1   : > { %v573_v7 = vadd.f32 %v846_v48, %v572_v2  ;;  %v641_v8 = vadd.f32 %v640_v1, %v610_v3  ;;  %546 = vst [vmem:[%s993_s28 + $0x70] sm:$0xff] %v850_v4  ;;  %562 = vst [vmem:[%s993_s28 + $0xf0] sm:$0xff] %v1054_v15  ;;  %v615_v27 = vmul.f32 %v850_v4, %v850_v4 }
  0xf2   : > { %v453_v9 = vpop.f32.mrf.mxu0  ;;  %v517_v20 = vpop.f32.mrf.mxu1  ;;  %v626_v1 = vmul.f32 %v504_v10, %v504_v10  ;;  %v627_v2 = vmul.f32 %v1037_v59, %v1037_v59 }
  0xf3   : > { %v642_v12 = vadd.f32 %v641_v8, %v611_v6  ;;  %544 = vst [vmem:[%s993_s28 + $0x60] sm:$0xff] %v453_v9  ;;  %v574_v13 = vadd.f32 %v847_v58, %v573_v7  ;;  %v613_v17 = vmul.f32 %v453_v9, %v453_v9  ;;  %560 = vst [vmem:[%s993_s28 + $0xe0] sm:$0xff] %v517_v20 }
  0xf4   : > { %v851_v14 = vpop.f32.mrf.mxu0  ;;  %v867_v26 = vpop.f32.mrf.mxu1  ;;  %v629_v8 = vmul.f32 %v517_v20, %v517_v20 }
  0xf5   : > { %v575_v16 = vadd.f32 %v574_v13, %v453_v9  ;;  %v643_v18 = vadd.f32 %v642_v12, %v612_v11  ;;  %547 = vst [vmem:[%s993_s28 + $0x78] sm:$0xff] %v851_v14  ;;  %563 = vst [vmem:[%s993_s28 + $0xf8] sm:$0xff] %v867_v26  ;;  %v616_v32 = vmul.f32 %v851_v14, %v851_v14 }
  0xf6   : > { %v456_v19 = vpop.f32.mrf.mxu0  ;;  %v520_v31 = vpop.f32.mrf.mxu1  ;;  %v631_v12 = vmul.f32 %v1054_v15, %v1054_v15 }
  0xf7   : > { %v644_v21 = vadd.f32 %v643_v18, %v613_v17  ;;  %545 = vst [vmem:[%s993_s28 + $0x68] sm:$0xff] %v456_v19  ;;  %v576_v23 = vadd.f32 %v575_v16, %v456_v19  ;;  %v614_v25 = vmul.f32 %v456_v19, %v456_v19  ;;  %561 = vst [vmem:[%s993_s28 + $0xe8] sm:$0xff] %v520_v31 }
  0xf9   : > { %v577_v28 = vadd.f32 %v850_v4, %v576_v23  ;;  %v645_v30 = vadd.f32 %v644_v21, %v614_v25  ;;  %v628_v4 = vmul.f32 %v1047_v5, %v1047_v5 }
  0xfb   : > { %v578_v33 = vadd.f32 %v851_v14, %v577_v28  ;;  %v646_v35 = vadd.f32 %v645_v30, %v615_v27  ;;  %v632_v14 = vmul.f32 %v867_v26, %v867_v26 }
  0xfd   : > { %v647_v37 = vadd.f32 %v646_v35, %v616_v32  ;;  %v579_v38 = vadd.f32 %v578_v33, %v1002_v24 }
  0xff   : > { %v580_v40 = vadd.f32 %v579_v38, %v1012_v34  ;;  %v648_v42 = vadd.f32 %v647_v37, %v617_v36 }
 0x101   : > { %v581_v45 = vadd.f32 %v997_v22, %v580_v40  ;;  %v649_v46 = vadd.f32 %v648_v42, %v618_v41  ;;  %v623_v22 = vmul.f32 %v1017_v39, %v1017_v39 }
 0x103   : > { %v650_v48 = vadd.f32 %v649_v46, %v619_v43  ;;  %v582_v50 = vadd.f32 %v1007_v29, %v581_v45  ;;  %v624_v29 = vmul.f32 %v1027_v49, %v1027_v49 }
 0x105   : > { %v583_v24 = vadd.f32 %v582_v50, %v1022_v44  ;;  %v651_v52 = vadd.f32 %v650_v48, %v620_v47 }
 0x107   : > { %v652_v34 = vadd.f32 %v651_v52, %v621_v51  ;;  %v584_v53 = vadd.f32 %v583_v24, %v1032_v54 }
 0x109   : > { %v585_v56 = vadd.f32 %v1017_v39, %v584_v53  ;;  %v653_v57 = vadd.f32 %v652_v34, %v622_v55 }
 0x10b   : > { %v654_v58 = vadd.f32 %v653_v57, %v623_v22  ;;  %v586_v60 = vadd.f32 %v1027_v49, %v585_v56 }
 0x10d   : > { %v587_v44 = vadd.f32 %v586_v60, %v1042_v0  ;;  %v655_v62 = vadd.f32 %v654_v58, %v624_v29 }
 0x10f   : > { %v656_v63 = vadd.f32 %v655_v62, %v625_v61  ;;  %v588_v54 = vadd.f32 %v587_v44, %v504_v10  ;;  %v630_v10 = vmul.f32 %v520_v31, %v520_v31 }
 0x111   : > { %v589_v39 = vadd.f32 %v1037_v59, %v588_v54  ;;  %v657_v3 = vadd.f32 %v656_v63, %v626_v1 }
 0x113   : > { %v658_v6 = vadd.f32 %v657_v3, %v627_v2  ;;  %v590_v49 = vadd.f32 %v1047_v5, %v589_v39 }
 0x115   : > { %v591_v7 = vadd.f32 %v590_v49, %v517_v20  ;;  %v659_v0 = vadd.f32 %v658_v6, %v628_v4  ;;  %v670_v20 = vlaneseq }
 0x117   : > { %v660_v9 = vadd.f32 %v659_v0, %v629_v8  ;;  %v592_v11 = vadd.f32 %v591_v7, %v520_v31  ;;  %v671_v30 = vshrl.u32 %v670_v20, 7 }
 0x119   : > { %v593_v59 = vadd.f32 %v1054_v15, %v592_v11  ;;  %v661_v13 = vadd.f32 %v660_v9, %v630_v10  ;;  %vm673_vm1 = vcmp.eq.s32.totalorder %v671_v30, 1  ;;  %vm672_vm2 = vcmp.eq.s32.totalorder %v671_v30, 0 }
 0x11b   : > { %v594_v16 = vadd.f32 %v867_v26, %v593_v59  ;;  %v662_v17 = vadd.f32 %v661_v13, %v631_v12 }
 0x11d   : > { %v595_v18 = vrot.slane %v594_v16, 4  ;;  %v663_v19 = vadd.f32 %v662_v17, %v632_v14 }
 0x11f   : > { %v596_v5 = vadd.f32 %v595_v18, %v594_v16  ;;  %v664_v21 = vrot.slane %v663_v19, 4 }
 0x121   : > { %v597_v23 = vrot.slane %v596_v5, 2  ;;  %v665_v25 = vadd.f32 %v664_v21, %v663_v19 }
 0x123   : > { %v598_v27 = vadd.f32 %v597_v23, %v596_v5  ;;  %v666_v28 = vrot.slane %v665_v25, 2 }
 0x125   : > { %v667_v31 = vadd.f32 %v666_v28, %v665_v25  ;;  %v599_v32 = vrot.slane %v598_v27, 1 }
 0x127   : > { %v668_v15 = vrot.slane %v667_v31, 1  ;;  %v600_v26 = vadd.f32 %v599_v32, %v598_v27 }
 0x129   : > { %v669_v33 = vadd.f32 %v668_v15, %v667_v31 }
 0x12b   : > { %v674_v35 = vsel %vm673_vm1, %v669_v33, 0.0 }
 0x12c   : > { %v675_v36 = vsel %vm672_vm2, %v600_v26, %v674_v35 }
 0x12d   : > { %676 = vst [vmem:[%s184_s5] sm:$0xff] %v675_v36 }
 0x12e PF: > { %s14_s12 = sadd.s32 1, %s907_s12  }
 0x12f   : > { %p11_p5 = scmp.ge.s32.totalorder %s14_s12, 4  }
 0x131   :  { %13 = sbr.rel (!%p11_p5) target bundleno = 1 (0x1), region = 70 }

// kernel: conv_block_forward.7
= control target key start
LH: loop header
LB: loop body
LE: loop exit
PB: predicated region body
PF: predicated region fallthrough
CT: control target
= control target key end

     0   :  { %s453_s12 = smov 0   ;;  %s612_s0 = inlined_call_operand.vmem [shape: f32[512,128], index: 0, kind: input, shape index: {}]   ;;  %s613_s1 = inlined_call_operand.vmem [shape: f32[1,128], index: 1, kind: input, shape index: {}]   ;;  %s614_s2 = inlined_call_operand.vmem [shape: f32[1,128], index: 2, kind: input, shape index: {}]   ;;  %s615_s3 = inlined_call_operand.vmem [shape: f32[512,128], index: 3, kind: output, shape index: {}]  }
   0x1 LB: > { %s404_s13 = sadd.s32 4294967295, %s431_s12   ;;  %p408_p0 = scmp.ge.s32.totalorder %s431_s12, 1  ;;  %s431_s12 = sphi %s453_s12, %s13_s12  }
   0x2   : > { %p138_p1 = scmp.lt.s32.totalorder %s431_s12, 3 }
   0x4   : > { %p139_p2 = pnand %p408_p0, %p138_p1 }
   0x5   : > { %s409_s14 = sshll.u32 (!%p139_p2), %s404_s13, 5 }
   0x6   : > { %142 = sbr.rel (%p139_p2) target bundleno = 44 (0x2c), region = 32  ;;  %p163_p3 = scmp.lt.s32.totalorder (!%p139_p2), %s409_s14, 63 }
   0xb   : > { %s617_s14 = smov (!%p163_p3, %s409_s14), 63  ;;  %v464_v0 = vld [vmem:[%s613_s1] ss:$0 sm:$0xff] }
   0xc   : > { %s410_s15 = sshll.u32 %s617_s14, 3  ;;  %v474_v1 = vld [vmem:[%s614_s2] ss:$0 sm:$0xff] }
   0xd   : > { %s469_s20 = scalar_lea.vmem %s612_s0, %s410_s15  ;;  %s497_s25 = scalar_lea.vmem %s615_s3, %s410_s15 }
   0xe   : > { %v174_v2 = vld [vmem:[%s469_s20] sm:$0xff]  ;;  %v175_v3 = vld [vmem:[%s469_s20 + $0x8] sm:$0xff]  ;;  %v176_v4 = vld [vmem:[%s469_s20 + $0x10] sm:$0xff] }
   0xf   : > { %v213_v5 = vmul.f32 %v464_v0, %v174_v2  ;;  %v214_v6 = vmul.f32 %v464_v0, %v175_v3  ;;  %v215_v7 = vmul.f32 %v464_v0, %v176_v4  ;;  %v177_v8 = vld [vmem:[%s469_s20 + $0x18] sm:$0xff]  ;;  %v178_v9 = vld [vmem:[%s469_s20 + $0x20] sm:$0xff]  ;;  %v179_v10 = vld [vmem:[%s469_s20 + $0x28] sm:$0xff] }
  0x10   : > { %v216_v11 = vmul.f32 %v464_v0, %v177_v8  ;;  %v217_v12 = vmul.f32 %v464_v0, %v178_v9  ;;  %v218_v13 = vmul.f32 %v464_v0, %v179_v10  ;;  %v180_v14 = vld [vmem:[%s469_s20 + $0x30] sm:$0xff]  ;;  %v181_v15 = vld [vmem:[%s469_s20 + $0x38] sm:$0xff]  ;;  %v182_v24 = vld [vmem:[%s469_s20 + $0x40] sm:$0xff] }
  0x11   : > { %v252_v16 = vadd.f32 %v474_v1, %v213_v5  ;;  %v253_v17 = vadd.f32 %v474_v1, %v214_v6  ;;  %v254_v18 = vadd.f32 %v474_v1, %v215_v7  ;;  %v219_v19 = vmul.f32 %v464_v0, %v180_v14  ;;  %v183_v25 = vld [vmem:[%s469_s20 + $0x48] sm:$0xff]  ;;  %v184_v26 = vld [vmem:[%s469_s20 + $0x50] sm:$0xff]  ;;  %v185_v31 = vld [vmem:[%s469_s20 + $0x58] sm:$0xff] }
  0x12   : > { %v255_v20 = vadd.f32 %v474_v1, %v216_v11  ;;  %v256_v21 = vadd.f32 %v474_v1, %v217_v12  ;;  %v257_v22 = vadd.f32 %v474_v1, %v218_v13  ;;  %v220_v23 = vmul.f32 %v464_v0, %v181_v15  ;;  %v186_v32 = vld [vmem:[%s469_s20 + $0x60] sm:$0xff]  ;;  %v187_v33 = vld [vmem:[%s469_s20 + $0x68] sm:$0xff]  ;;  %v188_v38 = vld [vmem:[%s469_s20 + $0x70] sm:$0xff] }
  0x13   : > { %v284_v27 = vmax.f32 %v252_v16, 0.0  ;;  %v285_v28 = vmax.f32 %v253_v17, 0.0  ;;  %v286_v29 = vmax.f32 %v254_v18, 0.0  ;;  %v258_v30 = vadd.f32 %v474_v1, %v219_v19  ;;  %v189_v43 = vld [vmem:[%s469_s20 + $0x78] sm:$0xff]  ;;  %v190_v56 = vld [vmem:[%s469_s20 + $0x80] sm:$0xff]  ;;  %v191_v57 = vld [vmem:[%s469_s20 + $0x88] sm:$0xff] }
  0x14   : > { %v287_v34 = vmax.f32 %v255_v20, 0.0  ;;  %v288_v35 = vmax.f32 %v256_v21, 0.0  ;;  %v289_v36 = vmax.f32 %v257_v22, 0.0  ;;  %v259_v37 = vadd.f32 %v474_v1, %v220_v23  ;;  %v192_v58 = vld [vmem:[%s469_s20 + $0x90] sm:$0xff]  ;;  %v193_v63 = vld [vmem:[%s469_s20 + $0x98] sm:$0xff]  ;;  %v194_v2 = vld [vmem:[%s469_s20 + $0xa0] sm:$0xff] }
  0x15   : > { %316 = vst [vmem:[%s497_s25] sm:$0xff] %v284_v27  ;;  %317 = vst [vmem:[%s497_s25 + $0x8] sm:$0xff] %v285_v28  ;;  %v290_v39 = vmax.f32 %v258_v30, 0.0  ;;  %v221_v40 = vmul.f32 %v464_v0, %v182_v24  ;;  %v222_v41 = vmul.f32 %v464_v0, %v183_v25  ;;  %v223_v42 = vmul.f32 %v464_v0, %v184_v26  ;;  %v195_v3 = vld [vmem:[%s469_s20 + $0xa8] sm:$0xff]  ;;  %v196_v8 = vld [vmem:[%s469_s20 + $0xb0] sm:$0xff] }
  0x16   : > { %318 = vst [vmem:[%s497_s25 + $0x10] sm:$0xff] %v286_v29  ;;  %319 = vst [vmem:[%s497_s25 + $0x18] sm:$0xff] %v287_v34  ;;  %v291_v44 = vmax.f32 %v259_v37, 0.0  ;;  %v224_v45 = vmul.f32 %v464_v0, %v185_v31  ;;  %v225_v46 = vmul.f32 %v464_v0, %v186_v32  ;;  %v226_v47 = vmul.f32 %v464_v0, %v187_v33  ;;  %v197_v13 = vld [vmem:[%s469_s20 + $0xb8] sm:$0xff]  ;;  %v198_v26 = vld [vmem:[%s469_s20 + $0xc0] sm:$0xff] }
  0x17   : > { %320 = vst [vmem:[%s497_s25 + $0x20] sm:$0xff] %v288_v35  ;;  %321 = vst [vmem:[%s497_s25 + $0x28] sm:$0xff] %v289_v36  ;;  %v260_v48 = vadd.f32 %v474_v1, %v221_v40  ;;  %v261_v49 = vadd.f32 %v474_v1, %v222_v41  ;;  %v262_v50 = vadd.f32 %v474_v1, %v223_v42  ;;  %v199_v27 = vld [vmem:[%s469_s20 + $0xc8] sm:$0xff]  ;;  %v200_v28 = vld [vmem:[%s469_s20 + $0xd0] sm:$0xff] }
  0x18   : > { %322 = vst [vmem:[%s497_s25 + $0x30] sm:$0xff] %v290_v39  ;;  %v227_v51 = vmul.f32 %v464_v0, %v188_v38  ;;  %323 = vst [vmem:[%s497_s25 + $0x38] sm:$0xff] %v291_v44  ;;  %v263_v52 = vadd.f32 %v474_v1, %v224_v45  ;;  %v264_v53 = vadd.f32 %v474_v1, %v225_v46  ;;  %v201_v33 = vld [vmem:[%s469_s20 + $0xd8] sm:$0xff]  ;;  %v202_v34 = vld [vmem:[%s469_s20 + $0xe0] sm:$0xff] }
  0x19   : > { %v265_v54 = vadd.f32 %v474_v1, %v226_v47  ;;  %v228_v55 = vmul.f32 %v464_v0, %v189_v43  ;;  %v292_v59 = vmax.f32 %v260_v48, 0.0  ;;  %v293_v60 = vmax.f32 %v261_v49, 0.0  ;;  %v203_v35 = vld [vmem:[%s469_s20 + $0xe8] sm:$0xff]  ;;  %v204_v40 = vld [vmem:[%s469_s20 + $0xf0] sm:$0xff]  ;;  %v205_v45 = vld [vmem:[%s469_s20 + $0xf8] sm:$0xff] }
  0x1a   : > { %v294_v61 = vmax.f32 %v262_v50, 0.0  ;;  %v266_v62 = vadd.f32 %v474_v1, %v227_v51  ;;  %v295_v4 = vmax.f32 %v263_v52, 0.0  ;;  %v296_v5 = vmax.f32 %v264_v53, 0.0 }
  0x1b   : > { %v297_v6 = vmax.f32 %v265_v54, 0.0  ;;  %v267_v7 = vadd.f32 %v474_v1, %v228_v55  ;;  %324 = vst [vmem:[%s497_s25 + $0x40] sm:$0xff] %v292_v59  ;;  %325 = vst [vmem:[%s497_s25 + $0x48] sm:$0xff] %v293_v60  ;;  %v229_v10 = vmul.f32 %v464_v0, %v190_v56  ;;  %v230_v11 = vmul.f32 %v464_v0, %v191_v57 }
  0x1c   : > { %326 = vst [vmem:[%s497_s25 + $0x50] sm:$0xff] %v294_v61  ;;  %v298_v9 = vmax.f32 %v266_v62, 0.0  ;;  %v231_v12 = vmul.f32 %v464_v0, %v192_v58  ;;  %327 = vst [vmem:[%s497_s25 + $0x58] sm:$0xff] %v295_v4  ;;  %v232_v15 = vmul.f32 %v464_v0, %v193_v63  ;;  %v233_v16 = vmul.f32 %v464_v0, %v194_v2 }
  0x1d   : > { %328 = vst [vmem:[%s497_s25 + $0x60] sm:$0xff] %v296_v5  ;;  %329 = vst [vmem:[%s497_s25 + $0x68] sm:$0xff] %v297_v6  ;;  %v299_v14 = vmax.f32 %v267_v7, 0.0  ;;  %v234_v17 = vmul.f32 %v464_v0, %v195_v3  ;;  %v268_v18 = vadd.f32 %v474_v1, %v229_v10  ;;  %v269_v19 = vadd.f32 %v474_v1, %v230_v11 }
  0x1e   : > { %330 = vst [vmem:[%s497_s25 + $0x70] sm:$0xff] %v298_v9  ;;  %v270_v20 = vadd.f32 %v474_v1, %v231_v12  ;;  %v235_v21 = vmul.f32 %v464_v0, %v196_v8  ;;  %v271_v22 = vadd.f32 %v474_v1, %v232_v15  ;;  %v272_v23 = vadd.f32 %v474_v1, %v233_v16 }
  0x1f   : > { %331 = vst [vmem:[%s497_s25 + $0x78] sm:$0xff] %v299_v14  ;;  %v273_v24 = vadd.f32 %v474_v1, %v234_v17  ;;  %v236_v25 = vmul.f32 %v464_v0, %v197_v13  ;;  %v300_v29 = vmax.f32 %v268_v18, 0.0  ;;  %v301_v30 = vmax.f32 %v269_v19, 0.0 }
  0x20   : > { %v302_v31 = vmax.f32 %v270_v20, 0.0  ;;  %v274_v32 = vadd.f32 %v474_v1, %v235_v21  ;;  %v303_v36 = vmax.f32 %v271_v22, 0.0  ;;  %v304_v37 = vmax.f32 %v272_v23, 0.0 }
  0x21   : > { %v305_v38 = vmax.f32 %v273_v24, 0.0  ;;  %v275_v39 = vadd.f32 %v474_v1, %v236_v25  ;;  %332 = vst [vmem:[%s497_s25 + $0x80] sm:$0xff] %v300_v29  ;;  %333 = vst [vmem:[%s497_s25 + $0x88] sm:$0xff] %v301_v30  ;;  %v237_v42 = vmul.f32 %v464_v0, %v198_v26  ;;  %v238_v43 = vmul.f32 %v464_v0, %v199_v27 }
  0x22   : > { %334 = vst [vmem:[%s497_s25 + $0x90] sm:$0xff] %v302_v31  ;;  %v306_v41 = vmax.f32 %v274_v32, 0.0  ;;  %v239_v44 = vmul.f32 %v464_v0, %v200_v28  ;;  %335 = vst [vmem:[%s497_s25 + $0x98] sm:$0xff] %v303_v36  ;;  %v240_v47 = vmul.f32 %v464_v0, %v201_v33  ;;  %v241_v48 = vmul.f32 %v464_v0, %v202_v34 }
  0x23   : > { %336 = vst [vmem:[%s497_s25 + $0xa0] sm:$0xff] %v304_v37  ;;  %337 = vst [vmem:[%s497_s25 + $0xa8] sm:$0xff] %v305_v38  ;;  %v307_v46 = vmax.f32 %v275_v39, 0.0  ;;  %v242_v49 = vmul.f32 %v464_v0, %v203_v35  ;;  %v276_v50 = vadd.f32 %v474_v1, %v237_v42  ;;  %v277_v51 = vadd.f32 %v474_v1, %v238_v43 }
  0x24   : > { %338 = vst [vmem:[%s497_s25 + $0xb0] sm:$0xff] %v306_v41  ;;  %v278_v52 = vadd.f32 %v474_v1, %v239_v44  ;;  %v243_v53 = vmul.f32 %v464_v0, %v204_v40  ;;  %v279_v54 = vadd.f32 %v474_v1, %v240_v47  ;;  %v280_v55 = vadd.f32 %v474_v1, %v241_v48 }
  0x25   : > { %339 = vst [vmem:[%s497_s25 + $0xb8] sm:$0xff] %v307_v46  ;;  %v281_v56 = vadd.f32 %v474_v1, %v242_v49  ;;  %v244_v57 = vmul.f32 %v464_v0, %v205_v45  ;;  %v308_v58 = vmax.f32 %v276_v50, 0.0  ;;  %v309_v59 = vmax.f32 %v277_v51, 0.0 }
  0x26   : > { %v310_v60 = vmax.f32 %v278_v52, 0.0  ;;  %v282_v61 = vadd.f32 %v474_v1, %v243_v53  ;;  %v311_v62 = vmax.f32 %v279_v54, 0.0  ;;  %v312_v63 = vmax.f32 %v280_v55, 0.0 }
  0x27   : > { %v313_v2 = vmax.f32 %v281_v56, 0.0  ;;  %v283_v3 = vadd.f32 %v474_v1, %v244_v57  ;;  %340 = vst [vmem:[%s497_s25 + $0xc0] sm:$0xff] %v308_v58  ;;  %341 = vst [vmem:[%s497_s25 + $0xc8] sm:$0xff] %v309_v59 }
  0x28   : > { %342 = vst [vmem:[%s497_s25 + $0xd0] sm:$0xff] %v310_v60  ;;  %v314_v4 = vmax.f32 %v282_v61, 0.0  ;;  %343 = vst [vmem:[%s497_s25 + $0xd8] sm:$0xff] %v311_v62 }
  0x29   : > { %344 = vst [vmem:[%s497_s25 + $0xe0] sm:$0xff] %v312_v63  ;;  %345 = vst [vmem:[%s497_s25 + $0xe8] sm:$0xff] %v313_v2  ;;  %v315_v0 = vmax.f32 %v283_v3, 0.0 }
  0x2a   : > { %346 = vst [vmem:[%s497_s25 + $0xf0] sm:$0xff] %v314_v4 }
  0x2b   : > { %347 = vst [vmem:[%s497_s25 + $0xf8] sm:$0xff] %v315_v0 }
  0x2c PF: > { %s13_s12 = sadd.s32 1, %s431_s12  }
  0x2d   : > { %p10_p4 = scmp.ge.s32.totalorder %s13_s12, 4  }
  0x2f   :  { %12 = sbr.rel (!%p10_p4) target bundleno = 1 (0x1), region = 62 }

// kernel: conv_block_forward.6
= control target key start
LH: loop header
LB: loop body
LE: loop exit
PB: predicated region body
PF: predicated region fallthrough
CT: control target
= control target key end

     0   :  { %s1506_s18 = smov 0   ;;  %s1664_s0 = inlined_call_operand.vmem [shape: bf16[512,48], index: 0, kind: input, shape index: {}]   ;;  %s1665_s1 = inlined_call_operand.vmem [shape: bf16[512,80], index: 1, kind: input, shape index: {}]   ;;  %s1666_s2 = inlined_call_operand.vmem [shape: bf16[48,128], index: 2, kind: input, shape index: {}]   ;;  %s1667_s3 = inlined_call_operand.vmem [shape: bf16[80,128], index: 3, kind: input, shape index: {}]   ;;  %s1668_s4 = inlined_call_operand.vmem [shape: f32[512,128], index: 4, kind: output, shape index: {0}]   ;;  %s1669_s5 = inlined_call_operand.vmem [shape: f32[2,8,128], index: 5, kind: output, shape index: {1}]  }
   0x1 LB: > { %s1512_s19 = sadd.s32 4294967295, %s1474_s18   ;;  %p1218_p0 = scmp.ge.s32.totalorder %s1474_s18, 1  ;;  %s1474_s18 = sphi %s1506_s18, %s16_s18  }
   0x2   : > { %p202_p1 = scmp.lt.s32.totalorder %s1474_s18, 3 }
   0x4   : > { %p203_p2 = pnand %p1218_p0, %p202_p1 }
   0x5   : > { %s1219_s22 = sshll.u32 (!%p203_p2), %s1512_s19, 5  ;;  %p257_p4 = scmp.lt.s32.totalorder (!%p203_p2), %s1512_s19, 1 }
   0x6   : > { %206 = sbr.rel (%p203_p2) target bundleno = 312 (0x138), region = 36  ;;  %p240_p3 = scmp.lt.s32.totalorder (!%p203_p2), %s1219_s22, 63 }
   0xb   : > { %v1428_v0 = vld [vmem:[%s1667_s3 + $0x20] sm:$0xff]   ;;  %v1429_v1 = vld [vmem:[%s1666_s2 + $0x10] sm:$0xff]   ;;  %v1430_v2 = vld [vmem:[%s1667_s3 + $0x18] sm:$0xff]   ;;  %s1671_s22 = smov (!%p240_p3, %s1219_s22), 63  ;;  %vm760_vm0 = vcmask 392192   ;;  %vm452_vm1 = vcmask 654336  }
   0xc   : > { %1340 = vmatprep.subr.bf16.mxu0 %v1428_v0  ;;  %1382 = vmatprep.subr.bf16.mxu1 %v1429_v1  ;;  %v1431_v3 = vld [vmem:[%s1666_s2 + $0x8] sm:$0xff]   ;;  %v1432_v4 = vld [vmem:[%s1667_s3 + $0x10] sm:$0xff]   ;;  %v1433_v5 = vld [vmem:[%s1666_s2] sm:$0xff]   ;;  %s1220_s8 = sshll.u32 %s1671_s22, 2  ;;  %s1224_s21 = sshll.u32 %s1671_s22, 3 }
   0xd   : > { %1341 = vmatpush3.bf16.msra.mxu0 %v1428_v0  ;;  %1383 = vmatpush3.bf16.msra.mxu1 %v1429_v1  ;;  %s1541_s11 = scalar_lea.vmem %s1664_s0, %s1220_s8  ;;  %s1547_s14 = scalar_lea.vmem %s1665_s1, %s1220_s8  ;;  %v1434_v7 = vld [vmem:[%s1667_s3 + $0x8] sm:$0xff]   ;;  %v1437_v10 = vld [vmem:[%s1667_s3] sm:$0xff]  }
   0xe   : > { %1342 = vmatprep.subr.bf16.mxu0 %v1430_v2  ;;  %1384 = vmatprep.subr.bf16.mxu1 %v1431_v3  ;;  %v1435_v6 = vld [vmem:[%s1541_s11] sm:$0xff]   ;;  %v1436_v8 = vld [vmem:[%s1541_s11 + $0x8] sm:$0xff]   ;;  %v1440_v11 = vld [vmem:[%s1541_s11 + $0x10] sm:$0xff]   ;;  %s1622_s25 = scalar_lea.vmem %s1668_s4, %s1224_s21  ;;  %s1673_s19 = smov (!%p257_p4, %s1512_s19), 1 }
   0xf   : > { %1388 = vmatprep.mubr.msk.bf16.mxu1 %vm760_vm0, %v1435_v6  ;;  %v1438_v9 = vld [vmem:[%s1547_s14] sm:$0xff]   ;;  %v1439_v12 = vld [vmem:[%s1547_s14 + $0x8] sm:$0xff]   ;;  %v1441_v13 = vld [vmem:[%s1541_s11 + $0x18] sm:$0xff]   ;;  %s1225_s22 = sshll.u32 %s1673_s19, 3 }
  0x10   : > { %1350 = vmatprep.mubr.msk.bf16.mxu0 %vm452_vm1, %v1438_v9  ;;  %v1442_v14 = vld [vmem:[%s1547_s14 + $0x10] sm:$0xff]   ;;  %v1444_v15 = vld [vmem:[%s1541_s11 + $0x20] sm:$0xff]   ;;  %v1443_v16 = vld [vmem:[%s1547_s14 + $0x18] sm:$0xff]   ;;  %s260_s28 = scalar_lea.vmem %s1669_s5, %s1225_s22 }
  0x11   : > { %1343 = vmatpush3.bf16.msra.mxu0 %v1430_v2  ;;  %1385 = vmatpush3.bf16.msra.mxu1 %v1431_v3  ;;  %v1445_v17 = vld [vmem:[%s1541_s11 + $0x28] sm:$0xff]   ;;  %v1446_v18 = vld [vmem:[%s1547_s14 + $0x20] sm:$0xff]   ;;  %v1448_v19 = vld [vmem:[%s1541_s11 + $0x30] sm:$0xff]  }
  0x12   : > { %1344 = vmatprep.subr.bf16.mxu0 %v1432_v4  ;;  %1386 = vmatprep.subr.bf16.mxu1 %v1433_v5  ;;  %v1447_v20 = vld [vmem:[%s1547_s14 + $0x28] sm:$0xff]   ;;  %v1449_v21 = vld [vmem:[%s1541_s11 + $0x38] sm:$0xff]   ;;  %v1450_v22 = vld [vmem:[%s1547_s14 + $0x30] sm:$0xff]  }
  0x13   : > { %v1452_v23 = vld [vmem:[%s1541_s11 + $0x40] sm:$0xff]   ;;  %v1451_v24 = vld [vmem:[%s1547_s14 + $0x38] sm:$0xff]   ;;  %v1453_v25 = vld [vmem:[%s1541_s11 + $0x48] sm:$0xff]  }
  0x14   : > { %v1454_v26 = vld [vmem:[%s1547_s14 + $0x40] sm:$0xff]   ;;  %v1456_v27 = vld [vmem:[%s1541_s11 + $0x50] sm:$0xff]   ;;  %v1455_v28 = vld [vmem:[%s1547_s14 + $0x48] sm:$0xff]  }
  0x15   : > { %1345 = vmatpush3.bf16.msra.mxu0 %v1432_v4  ;;  %1387 = vmatpush3.bf16.msra.mxu1 %v1433_v5  ;;  %v1457_v29 = vld [vmem:[%s1541_s11 + $0x58] sm:$0xff]   ;;  %v1458_v30 = vld [vmem:[%s1547_s14 + $0x50] sm:$0xff]   ;;  %v1460_v31 = vld [vmem:[%s1541_s11 + $0x60] sm:$0xff]  }
  0x16   : > { %1346 = vmatprep.subr.bf16.mxu0 %v1434_v7  ;;  %v1459_v32 = vld [vmem:[%s1547_s14 + $0x58] sm:$0xff]   ;;  %v1461_v33 = vld [vmem:[%s1541_s11 + $0x68] sm:$0xff]   ;;  %v1462_v34 = vld [vmem:[%s1547_s14 + $0x60] sm:$0xff]  }
  0x17   : > { %v1464_v35 = vld [vmem:[%s1541_s11 + $0x70] sm:$0xff]   ;;  %v1463_v36 = vld [vmem:[%s1547_s14 + $0x68] sm:$0xff]   ;;  %v1465_v37 = vld [vmem:[%s1541_s11 + $0x78] sm:$0xff]  }
  0x18   : > { %1389 = vmatmul.mubr.msk.bf16.vlgmr.msra.gmra.mxu1 %vm760_vm0, %v1436_v8  ;;  %v1466_v38 = vld [vmem:[%s1547_s14 + $0x70] sm:$0xff]   ;;  %v1467_v39 = vld [vmem:[%s1547_s14 + $0x78] sm:$0xff]  }
  0x19   : > { %1347 = vmatpush3.bf16.msra.mxu0 %v1434_v7  ;;  %1392 = vmatprep.mubr.msk.bf16.mxu1 %vm760_vm0, %v1440_v11 }
  0x1a   : > { %1348 = vmatprep.subr.bf16.mxu0 %v1437_v10 }
  0x1d   : > { %1349 = vmatpush3.bf16.msra.mxu0 %v1437_v10 }
  0x20   : > { %1351 = vmatmul.mubr.msk.bf16.vlgmr.msra.gmra.mxu0 %vm452_vm1, %v1439_v12  ;;  %1393 = vmatmul.mubr.msk.bf16.gmra.mxu1 %vm760_vm0, %v1441_v13 }
  0x21   : > { %1354 = vmatprep.mubr.msk.bf16.mxu0 %vm452_vm1, %v1442_v14  ;;  %1396 = vmatprep.mubr.msk.bf16.mxu1 %vm760_vm0, %v1444_v15 }
  0x28   : > { %1355 = vmatmul.mubr.msk.bf16.gmra.mxu0 %vm452_vm1, %v1443_v16  ;;  %1397 = vmatmul.mubr.msk.bf16.gmra.mxu1 %vm760_vm0, %v1445_v17 }
  0x29   : > { %1358 = vmatprep.mubr.msk.bf16.mxu0 %vm452_vm1, %v1446_v18  ;;  %1400 = vmatprep.mubr.msk.bf16.mxu1 %vm760_vm0, %v1448_v19 }
  0x30   : > { %1359 = vmatmul.mubr.msk.bf16.gmra.mxu0 %vm452_vm1, %v1447_v20  ;;  %1401 = vmatmul.mubr.msk.bf16.gmra.mxu1 %vm760_vm0, %v1449_v21 }
  0x31   : > { %1362 = vmatprep.mubr.msk.bf16.mxu0 %vm452_vm1, %v1450_v22  ;;  %1404 = vmatprep.mubr.msk.bf16.mxu1 %vm760_vm0, %v1452_v23 }
  0x38   : > { %1363 = vmatmul.mubr.msk.bf16.gmra.mxu0 %vm452_vm1, %v1451_v24  ;;  %1405 = vmatmul.mubr.msk.bf16.gmra.mxu1 %vm760_vm0, %v1453_v25 }
  0x39   : > { %1366 = vmatprep.mubr.msk.bf16.mxu0 %vm452_vm1, %v1454_v26  ;;  %1408 = vmatprep.mubr.msk.bf16.mxu1 %vm760_vm0, %v1456_v27 }
  0x40   : > { %1367 = vmatmul.mubr.msk.bf16.gmra.mxu0 %vm452_vm1, %v1455_v28  ;;  %1409 = vmatmul.mubr.msk.bf16.gmra.mxu1 %vm760_vm0, %v1457_v29 }
  0x41   : > { %1370 = vmatprep.mubr.msk.bf16.mxu0 %vm452_vm1, %v1458_v30  ;;  %1412 = vmatprep.mubr.msk.bf16.mxu1 %vm760_vm0, %v1460_v31 }
  0x48   : > { %1371 = vmatmul.mubr.msk.bf16.gmra.mxu0 %vm452_vm1, %v1459_v32  ;;  %1413 = vmatmul.mubr.msk.bf16.gmra.mxu1 %vm760_vm0, %v1461_v33 }
  0x49   : > { %1374 = vmatprep.mubr.msk.bf16.mxu0 %vm452_vm1, %v1462_v34  ;;  %1416 = vmatprep.mubr.msk.bf16.mxu1 %vm760_vm0, %v1464_v35 }
  0x50   : > { %1375 = vmatmul.mubr.msk.bf16.gmra.mxu0 %vm452_vm1, %v1463_v36  ;;  %1417 = vmatmul.mubr.msk.bf16.gmra.mxu1 %vm760_vm0, %v1465_v37 }
  0x51   : > { %1378 = vmatprep.mubr.msk.bf16.mxu0 %vm452_vm1, %v1466_v38 }
  0x58   : > { %1379 = vmatmul.mubr.msk.bf16.gmra.mxu0 %vm452_vm1, %v1467_v39 }
  0xd8   : > { %v1390_v40 = vpop.f32.mrf.mxu1 }
  0xda   : > { %v843_v41 = vpop.f32.mrf.mxu1 }
  0xdc   : > { %v1391_v42 = vpop.f32.mrf.mxu1 }
  0xde   : > { %v846_v43 = vpop.f32.mrf.mxu1 }
  0xe0   : > { %v1352_v44 = vpop.f32.mrf.mxu0  ;;  %v1394_v46 = vpop.f32.mrf.mxu1 }
  0xe1   : > { %v852_v45 = vadd.f32 %v1390_v40, %v1352_v44 }
  0xe2   : > { %v535_v47 = vpop.f32.mrf.mxu0  ;;  %v859_v49 = vpop.f32.mrf.mxu1 }
  0xe3   : > { %972 = vst [vmem:[%s1622_s25 + $0x10] sm:$0xff] %v852_v45  ;;  %v844_v48 = vadd.f32 %v843_v41, %v535_v47  ;;  %v1041_v63 = vmul.f32 %v852_v45, %v852_v45 }
  0xe4   : > { %v1353_v50 = vpop.f32.mrf.mxu0  ;;  %v1395_v52 = vpop.f32.mrf.mxu1 }
  0xe5   : > { %970 = vst [vmem:[%s1622_s25] sm:$0xff] %v844_v48  ;;  %v855_v51 = vadd.f32 %v1391_v42, %v1353_v50  ;;  %v1039_v57 = vmul.f32 %v844_v48, %v844_v48 }
  0xe6   : > { %v538_v53 = vpop.f32.mrf.mxu0  ;;  %v862_v55 = vpop.f32.mrf.mxu1 }
  0xe7   : > { %973 = vst [vmem:[%s1622_s25 + $0x18] sm:$0xff] %v855_v51  ;;  %v847_v54 = vadd.f32 %v846_v43, %v538_v53  ;;  %v1042_v5 = vmul.f32 %v855_v51, %v855_v51 }
  0xe8   : > { %v1356_v56 = vpop.f32.mrf.mxu0  ;;  %v1398_v61 = vpop.f32.mrf.mxu1 }
  0xe9   : > { %971 = vst [vmem:[%s1622_s25 + $0x8] sm:$0xff] %v847_v54  ;;  %v1002_v58 = vadd.f32 %v847_v54, %v844_v48  ;;  %v1040_v59 = vmul.f32 %v847_v54, %v847_v54  ;;  %v868_v60 = vadd.f32 %v1394_v46, %v1356_v56 }
  0xea   : > { %v551_v62 = vpop.f32.mrf.mxu0  ;;  %v875_v3 = vpop.f32.mrf.mxu1 }
  0xeb   : > { %v1003_v0 = vadd.f32 %v1002_v58, %v852_v45  ;;  %v1071_v1 = vadd.f32 %v1040_v59, %v1039_v57  ;;  %976 = vst [vmem:[%s1622_s25 + $0x30] sm:$0xff] %v868_v60  ;;  %v860_v2 = vadd.f32 %v859_v49, %v551_v62  ;;  %v1045_v23 = vmul.f32 %v868_v60, %v868_v60 }
  0xec   : > { %v1357_v4 = vpop.f32.mrf.mxu0  ;;  %v1399_v9 = vpop.f32.mrf.mxu1 }
  0xed   : > { %v1072_v6 = vadd.f32 %v1071_v1, %v1041_v63  ;;  %974 = vst [vmem:[%s1622_s25 + $0x20] sm:$0xff] %v860_v2  ;;  %v1004_v7 = vadd.f32 %v1003_v0, %v855_v51  ;;  %v871_v8 = vadd.f32 %v1395_v52, %v1357_v4  ;;  %v1043_v12 = vmul.f32 %v860_v2, %v860_v2 }
  0xee   : > { %v554_v10 = vpop.f32.mrf.mxu0  ;;  %v878_v15 = vpop.f32.mrf.mxu1 }
  0xef   : > { %v1005_v11 = vadd.f32 %v1004_v7, %v860_v2  ;;  %v1073_v13 = vadd.f32 %v1072_v6, %v1042_v5  ;;  %977 = vst [vmem:[%s1622_s25 + $0x38] sm:$0xff] %v871_v8  ;;  %v863_v14 = vadd.f32 %v862_v55, %v554_v10  ;;  %v1046_v29 = vmul.f32 %v871_v8, %v871_v8 }
  0xf0   : > { %v1360_v16 = vpop.f32.mrf.mxu0  ;;  %v1402_v21 = vpop.f32.mrf.mxu1 }
  0xf1   : > { %v1074_v17 = vadd.f32 %v1073_v13, %v1043_v12  ;;  %975 = vst [vmem:[%s1622_s25 + $0x28] sm:$0xff] %v863_v14  ;;  %v1006_v18 = vadd.f32 %v1005_v11, %v863_v14  ;;  %v1044_v19 = vmul.f32 %v863_v14, %v863_v14  ;;  %v884_v20 = vadd.f32 %v1398_v61, %v1360_v16 }
  0xf2   : > { %v567_v22 = vpop.f32.mrf.mxu0  ;;  %v891_v27 = vpop.f32.mrf.mxu1 }
  0xf3   : > { %v1007_v24 = vadd.f32 %v1006_v18, %v868_v60  ;;  %v1075_v25 = vadd.f32 %v1074_v17, %v1044_v19  ;;  %980 = vst [vmem:[%s1622_s25 + $0x50] sm:$0xff] %v884_v20  ;;  %v876_v26 = vadd.f32 %v875_v3, %v567_v22  ;;  %v1049_v47 = vmul.f32 %v884_v20, %v884_v20 }
  0xf4   : > { %v1361_v28 = vpop.f32.mrf.mxu0  ;;  %v1403_v33 = vpop.f32.mrf.mxu1 }
  0xf5   : > { %v1076_v30 = vadd.f32 %v1075_v25, %v1045_v23  ;;  %978 = vst [vmem:[%s1622_s25 + $0x40] sm:$0xff] %v876_v26  ;;  %v1008_v31 = vadd.f32 %v1007_v24, %v871_v8  ;;  %v887_v32 = vadd.f32 %v1399_v9, %v1361_v28  ;;  %v1047_v36 = vmul.f32 %v876_v26, %v876_v26 }
  0xf6   : > { %v570_v34 = vpop.f32.mrf.mxu0  ;;  %v894_v39 = vpop.f32.mrf.mxu1 }
  0xf7   : > { %v1009_v35 = vadd.f32 %v1008_v31, %v876_v26  ;;  %v1077_v37 = vadd.f32 %v1076_v30, %v1046_v29  ;;  %981 = vst [vmem:[%s1622_s25 + $0x58] sm:$0xff] %v887_v32  ;;  %v879_v38 = vadd.f32 %v878_v15, %v570_v34  ;;  %v1050_v53 = vmul.f32 %v887_v32, %v887_v32 }
  0xf8   : > { %v1364_v40 = vpop.f32.mrf.mxu0  ;;  %v1406_v45 = vpop.f32.mrf.mxu1 }
  0xf9   : > { %v1078_v41 = vadd.f32 %v1077_v37, %v1047_v36  ;;  %979 = vst [vmem:[%s1622_s25 + $0x48] sm:$0xff] %v879_v38  ;;  %v1010_v42 = vadd.f32 %v1009_v35, %v879_v38  ;;  %v1048_v43 = vmul.f32 %v879_v38, %v879_v38  ;;  %v900_v44 = vadd.f32 %v1402_v21, %v1364_v40 }
  0xfa   : > { %v583_v46 = vpop.f32.mrf.mxu0  ;;  %v907_v51 = vpop.f32.mrf.mxu1 }
  0xfb   : > { %v1011_v48 = vadd.f32 %v1010_v42, %v884_v20  ;;  %v1079_v49 = vadd.f32 %v1078_v41, %v1048_v43  ;;  %984 = vst [vmem:[%s1622_s25 + $0x70] sm:$0xff] %v900_v44  ;;  %v892_v50 = vadd.f32 %v891_v27, %v583_v46  ;;  %v1053_v7 = vmul.f32 %v900_v44, %v900_v44 }
  0xfc   : > { %v1365_v52 = vpop.f32.mrf.mxu0  ;;  %v1407_v57 = vpop.f32.mrf.mxu1 }
  0xfd   : > { %v1080_v54 = vadd.f32 %v1079_v49, %v1049_v47  ;;  %982 = vst [vmem:[%s1622_s25 + $0x60] sm:$0xff] %v892_v50  ;;  %v1012_v55 = vadd.f32 %v1011_v48, %v887_v32  ;;  %v903_v56 = vadd.f32 %v1403_v33, %v1365_v52  ;;  %v1051_v60 = vmul.f32 %v892_v50, %v892_v50 }
  0xfe   : > { %v586_v58 = vpop.f32.mrf.mxu0  ;;  %v910_v63 = vpop.f32.mrf.mxu1 }
  0xff   : > { %v1013_v59 = vadd.f32 %v1012_v55, %v892_v50  ;;  %v1081_v61 = vadd.f32 %v1080_v54, %v1050_v53  ;;  %985 = vst [vmem:[%s1622_s25 + $0x78] sm:$0xff] %v903_v56  ;;  %v895_v62 = vadd.f32 %v894_v39, %v586_v58  ;;  %v1054_v13 = vmul.f32 %v903_v56, %v903_v56 }
 0x100   : > { %v1368_v0 = vpop.f32.mrf.mxu0  ;;  %v1410_v5 = vpop.f32.mrf.mxu1 }
 0x101   : > { %v1082_v1 = vadd.f32 %v1081_v61, %v1051_v60  ;;  %983 = vst [vmem:[%s1622_s25 + $0x68] sm:$0xff] %v895_v62  ;;  %v1014_v2 = vadd.f32 %v1013_v59, %v895_v62  ;;  %v1052_v3 = vmul.f32 %v895_v62, %v895_v62  ;;  %v916_v4 = vadd.f32 %v1406_v45, %v1368_v0 }
 0x102   : > { %v599_v6 = vpop.f32.mrf.mxu0  ;;  %v923_v11 = vpop.f32.mrf.mxu1 }
 0x103   : > { %v1015_v8 = vadd.f32 %v1014_v2, %v900_v44  ;;  %v1083_v9 = vadd.f32 %v1082_v1, %v1052_v3  ;;  %988 = vst [vmem:[%s1622_s25 + $0x90] sm:$0xff] %v916_v4  ;;  %v908_v10 = vadd.f32 %v907_v51, %v599_v6  ;;  %v1057_v31 = vmul.f32 %v916_v4, %v916_v4 }
 0x104   : > { %v1369_v12 = vpop.f32.mrf.mxu0  ;;  %v1411_v17 = vpop.f32.mrf.mxu1 }
 0x105   : > { %v1084_v14 = vadd.f32 %v1083_v9, %v1053_v7  ;;  %986 = vst [vmem:[%s1622_s25 + $0x80] sm:$0xff] %v908_v10  ;;  %v1016_v15 = vadd.f32 %v1015_v8, %v903_v56  ;;  %v919_v16 = vadd.f32 %v1407_v57, %v1369_v12  ;;  %v1055_v20 = vmul.f32 %v908_v10, %v908_v10 }
 0x106   : > { %v602_v18 = vpop.f32.mrf.mxu0  ;;  %v926_v23 = vpop.f32.mrf.mxu1 }
 0x107   : > { %v1017_v19 = vadd.f32 %v1016_v15, %v908_v10  ;;  %v1085_v21 = vadd.f32 %v1084_v14, %v1054_v13  ;;  %989 = vst [vmem:[%s1622_s25 + $0x98] sm:$0xff] %v919_v16  ;;  %v911_v22 = vadd.f32 %v910_v63, %v602_v18  ;;  %v1058_v37 = vmul.f32 %v919_v16, %v919_v16 }
 0x108   : > { %v1372_v24 = vpop.f32.mrf.mxu0  ;;  %v1414_v29 = vpop.f32.mrf.mxu1 }
 0x109   : > { %v1086_v25 = vadd.f32 %v1085_v21, %v1055_v20  ;;  %987 = vst [vmem:[%s1622_s25 + $0x88] sm:$0xff] %v911_v22  ;;  %v1018_v26 = vadd.f32 %v1017_v19, %v911_v22  ;;  %v1056_v27 = vmul.f32 %v911_v22, %v911_v22  ;;  %v932_v28 = vadd.f32 %v1410_v5, %v1372_v24 }
 0x10a   : > { %v615_v30 = vpop.f32.mrf.mxu0  ;;  %v939_v35 = vpop.f32.mrf.mxu1 }
 0x10b   : > { %v1019_v32 = vadd.f32 %v1018_v26, %v916_v4  ;;  %v1087_v33 = vadd.f32 %v1086_v25, %v1056_v27  ;;  %992 = vst [vmem:[%s1622_s25 + $0xb0] sm:$0xff] %v932_v28  ;;  %v924_v34 = vadd.f32 %v923_v11, %v615_v30  ;;  %v1061_v55 = vmul.f32 %v932_v28, %v932_v28 }
 0x10c   : > { %v1373_v36 = vpop.f32.mrf.mxu0  ;;  %v1415_v41 = vpop.f32.mrf.mxu1 }
 0x10d   : > { %v1088_v38 = vadd.f32 %v1087_v33, %v1057_v31  ;;  %990 = vst [vmem:[%s1622_s25 + $0xa0] sm:$0xff] %v924_v34  ;;  %v1020_v39 = vadd.f32 %v1019_v32, %v919_v16  ;;  %v935_v40 = vadd.f32 %v1411_v17, %v1373_v36  ;;  %v1059_v44 = vmul.f32 %v924_v34, %v924_v34 }
 0x10e   : > { %v618_v42 = vpop.f32.mrf.mxu0  ;;  %v942_v47 = vpop.f32.mrf.mxu1 }
 0x10f   : > { %v1021_v43 = vadd.f32 %v1020_v39, %v924_v34  ;;  %v1089_v45 = vadd.f32 %v1088_v38, %v1058_v37  ;;  %993 = vst [vmem:[%s1622_s25 + $0xb8] sm:$0xff] %v935_v40  ;;  %v927_v46 = vadd.f32 %v926_v23, %v618_v42  ;;  %v1062_v60 = vmul.f32 %v935_v40, %v935_v40 }
 0x110   : > { %v1376_v48 = vpop.f32.mrf.mxu0  ;;  %v1418_v54 = vpop.f32.mrf.mxu1 }
 0x111   : > { %v1090_v49 = vadd.f32 %v1089_v45, %v1059_v44  ;;  %991 = vst [vmem:[%s1622_s25 + $0xa8] sm:$0xff] %v927_v46  ;;  %v1022_v50 = vadd.f32 %v1021_v43, %v927_v46  ;;  %v1060_v51 = vmul.f32 %v927_v46, %v927_v46  ;;  %v948_v52 = vadd.f32 %v1414_v29, %v1376_v48 }
 0x112   : > { %v631_v53 = vpop.f32.mrf.mxu0  ;;  %v955_v0 = vpop.f32.mrf.mxu1 }
 0x113   : > { %v1023_v56 = vadd.f32 %v1022_v50, %v932_v28  ;;  %v1091_v57 = vadd.f32 %v1090_v49, %v1060_v51  ;;  %996 = vst [vmem:[%s1622_s25 + $0xd0] sm:$0xff] %v948_v52  ;;  %v940_v58 = vadd.f32 %v939_v35, %v631_v53  ;;  %v1065_v13 = vmul.f32 %v948_v52, %v948_v52 }
 0x114   : > { %v1377_v59 = vpop.f32.mrf.mxu0  ;;  %v1419_v11 = vpop.f32.mrf.mxu1 }
 0x115   : > { %v1092_v61 = vadd.f32 %v1091_v57, %v1061_v55  ;;  %994 = vst [vmem:[%s1622_s25 + $0xc0] sm:$0xff] %v940_v58  ;;  %v1024_v62 = vadd.f32 %v1023_v56, %v935_v40  ;;  %v951_v63 = vadd.f32 %v1415_v41, %v1377_v59  ;;  %v1063_v3 = vmul.f32 %v940_v58, %v940_v58 }
 0x116   : > { %v634_v1 = vpop.f32.mrf.mxu0  ;;  %v958_v22 = vpop.f32.mrf.mxu1  ;;  %v1108_v41 = vlaneseq }
 0x117   : > { %v1025_v2 = vadd.f32 %v1024_v62, %v940_v58  ;;  %v1093_v4 = vadd.f32 %v1092_v61, %v1062_v60  ;;  %997 = vst [vmem:[%s1622_s25 + $0xd8] sm:$0xff] %v951_v63  ;;  %v943_v5 = vadd.f32 %v942_v47, %v634_v1  ;;  %v1066_v18 = vmul.f32 %v951_v63, %v951_v63 }
 0x118   : > { %v1380_v6 = vpop.f32.mrf.mxu0  ;;  %v1109_v46 = vshrl.u32 %v1108_v41, 7 }
 0x119   : > { %v1094_v7 = vadd.f32 %v1093_v4, %v1063_v3  ;;  %995 = vst [vmem:[%s1622_s25 + $0xc8] sm:$0xff] %v943_v5  ;;  %v1026_v8 = vadd.f32 %v1025_v2, %v943_v5  ;;  %v1064_v9 = vmul.f32 %v943_v5, %v943_v5  ;;  %v964_v10 = vadd.f32 %v1418_v54, %v1380_v6 }
 0x11a   : > { %v647_v12 = vpop.f32.mrf.mxu0  ;;  %vm1111_vm2 = vcmp.eq.s32.totalorder %v1109_v46, 1  ;;  %vm1110_vm3 = vcmp.eq.s32.totalorder %v1109_v46, 0 }
 0x11b   : > { %v1027_v14 = vadd.f32 %v1026_v8, %v948_v52  ;;  %v1095_v15 = vadd.f32 %v1094_v7, %v1064_v9  ;;  %1000 = vst [vmem:[%s1622_s25 + $0xf0] sm:$0xff] %v964_v10  ;;  %v956_v16 = vadd.f32 %v955_v0, %v647_v12  ;;  %v1069_v31 = vmul.f32 %v964_v10, %v964_v10 }
 0x11c   : > { %v1381_v17 = vpop.f32.mrf.mxu0 }
 0x11d   : > { %v1096_v19 = vadd.f32 %v1095_v15, %v1065_v13  ;;  %998 = vst [vmem:[%s1622_s25 + $0xe0] sm:$0xff] %v956_v16  ;;  %v1028_v20 = vadd.f32 %v1027_v14, %v951_v63  ;;  %v967_v21 = vadd.f32 %v1419_v11, %v1381_v17  ;;  %v1067_v25 = vmul.f32 %v956_v16, %v956_v16 }
 0x11e   : > { %v650_v23 = vpop.f32.mrf.mxu0 }
 0x11f   : > { %v1029_v24 = vadd.f32 %v1028_v20, %v956_v16  ;;  %v1097_v26 = vadd.f32 %v1096_v19, %v1066_v18  ;;  %1001 = vst [vmem:[%s1622_s25 + $0xf8] sm:$0xff] %v967_v21  ;;  %v959_v27 = vadd.f32 %v958_v22, %v650_v23  ;;  %v1070_v34 = vmul.f32 %v967_v21, %v967_v21 }
 0x121   : > { %v1098_v28 = vadd.f32 %v1097_v26, %v1067_v25  ;;  %999 = vst [vmem:[%s1622_s25 + $0xe8] sm:$0xff] %v959_v27  ;;  %v1030_v29 = vadd.f32 %v1029_v24, %v959_v27  ;;  %v1068_v30 = vmul.f32 %v959_v27, %v959_v27 }
 0x123   : > { %v1031_v32 = vadd.f32 %v1030_v29, %v964_v10  ;;  %v1099_v33 = vadd.f32 %v1098_v28, %v1068_v30 }
 0x125   : > { %v1032_v35 = vadd.f32 %v1031_v32, %v967_v21  ;;  %v1100_v36 = vadd.f32 %v1099_v33, %v1069_v31 }
 0x127   : > { %v1033_v37 = vrot.slane %v1032_v35, 4  ;;  %v1101_v38 = vadd.f32 %v1100_v36, %v1070_v34 }
 0x129   : > { %v1034_v39 = vadd.f32 %v1033_v37, %v1032_v35  ;;  %v1102_v40 = vrot.slane %v1101_v38, 4 }
 0x12b   : > { %v1035_v42 = vrot.slane %v1034_v39, 2  ;;  %v1103_v43 = vadd.f32 %v1102_v40, %v1101_v38 }
 0x12d   : > { %v1036_v44 = vadd.f32 %v1035_v42, %v1034_v39  ;;  %v1104_v45 = vrot.slane %v1103_v43, 2 }
 0x12f   : > { %v1105_v47 = vadd.f32 %v1104_v45, %v1103_v43  ;;  %v1037_v48 = vrot.slane %v1036_v44, 1 }
 0x131   : > { %v1106_v49 = vrot.slane %v1105_v47, 1  ;;  %v1038_v51 = vadd.f32 %v1037_v48, %v1036_v44 }
 0x133   : > { %v1107_v50 = vadd.f32 %v1106_v49, %v1105_v47 }
 0x135   : > { %v1112_v52 = vsel %vm1111_vm2, %v1107_v50, 0.0 }
 0x136   : > { %v1113_v53 = vsel %vm1110_vm3, %v1038_v51, %v1112_v52 }
 0x137   : > { %1114 = vst [vmem:[%s260_s28] sm:$0xff] %v1113_v53 }
 0x138 PF: > { %s16_s18 = sadd.s32 1, %s1474_s18  }
 0x139   : > { %p13_p5 = scmp.ge.s32.totalorder %s16_s18, 4  }
 0x13b   :  { %15 = sbr.rel (!%p13_p5) target bundleno = 1 (0x1), region = 81 }

</bundles_post_ra>
